<compile_context>
chip_gen: v7x
topology: tpu7x:2x2x1
jax: 0.10.0
libtpu: 0.0.40
codegen_flags: <defaults>
</compile_context>

<pallas_src>
import functools
import math

import jax
import jax.numpy as jnp
from jax.experimental import pallas as pl
from jax.experimental.pallas import tpu as pltpu


# ----------------------------- hardware config --------------------------------

def _tpu_config():
    """Per-generation tiling targets and scoped-VMEM limits."""
    try:
        kind = jax.devices()[0].device_kind.lower()
    except Exception:
        kind = ""
    if any(t in kind for t in ("v4", "v5", "v6")):
        # 128 MiB VMEM class: generous scoped limit, large tiles (amortize the
        # ~0.35us/grid-step overhead, feed the 256-wide MXU full operands).
        return dict(vmem=96 * 1024 * 1024, row_tile=512, seq_tile=512,
                    ffn_tile=1024, vocab_tile=512, k_tile=1024)
    # v7x (64 MiB / TensorCore) or unknown: leave pipelining headroom.
    return dict(vmem=48 * 1024 * 1024, row_tile=256, seq_tile=256,
                ffn_tile=512, vocab_tile=256, k_tile=512)


# ----------------------------- tiling helpers ----------------------------------

def _round_up(n, m):
    return ((n + m - 1) // m) * m


def _pick_tile(n, target, granule):
    """Largest divisor of n that is <= target and a multiple of `granule`.
    Falls back to the full dimension (always a legal block)."""
    if n <= target:
        return n
    t = (target // granule) * granule
    while t >= granule:
        if n % t == 0:
            return t
        t -= granule
    return n


def _row_tiling(n, target):
    """Return (tile, padded_n): pad instead of falling back to one huge block."""
    if n <= target:
        t = _round_up(n, 8)
        return t, t
    if n % target == 0:
        return target, n
    t = _pick_tile(n, target, 8)
    if t != n and t >= max(8, target // 2):
        return t, n
    return target, _round_up(n, target)


def _seq_tiling(s, target):
    """Return (seq_tile, padded_seq). target is a multiple of 128."""
    if s <= target:
        t = _round_up(s, 8)
        return t, t
    return target, _round_up(s, target)


# ----------------------------- in-kernel helpers -------------------------------

def _erf(x):
    # Abramowitz & Stegun 7.1.26 polynomial approximation (|err| < 1.5e-7).
    a1 = jnp.float32(0.254829592)
    a2 = jnp.float32(-0.284496736)
    a3 = jnp.float32(1.421413741)
    a4 = jnp.float32(-1.453152027)
    a5 = jnp.float32(1.061405429)
    p = jnp.float32(0.3275911)
    sign = jnp.where(x >= 0, jnp.float32(1.0), jnp.float32(-1.0))
    ax = jnp.abs(x)
    t = 1.0 / (1.0 + p * ax)
    poly = ((((a5 * t + a4) * t + a3) * t + a2) * t + a1) * t
    return sign * (1.0 - poly * jnp.exp(-ax * ax))


def _gelu_exact(x):
    # PyTorch nn.GELU() default = exact erf-based GELU (f32 VPU math).
    return 0.5 * x * (1.0 + _erf(x * jnp.float32(0.7071067811865476)))


def _layernorm(v, g, b, eps):
    mu = jnp.mean(v, axis=-1, keepdims=True)
    var = jnp.mean((v - mu) ** 2, axis=-1, keepdims=True)
    return (v - mu) * jax.lax.rsqrt(var + jnp.float32(eps)) * g + b


_NEG_BIG = -1e30   # finite "masked" value: avoids NaN from (-inf) - (-inf)


# ----------------------------- Pallas kernels ----------------------------------

def _ln_qkv_kernel(x_ref, g_ref, b_ref, w_ref, bias_ref, q_ref, k_ref, v_ref,
                   *, eps, emb, fused, q_scale):
    """Pre-LN + fused Q/K/V projection for one tile of rows (scale folded into q)."""
    a = _layernorm(x_ref[...], g_ref[...], b_ref[...], eps).astype(jnp.bfloat16)
    if fused:
        # Single N=3E matmul; lane-aligned splits (emb % 128 == 0).
        qkv = jnp.dot(a, w_ref[...], preferred_element_type=jnp.float32) + bias_ref[...]
        q = qkv[:, :emb]
        k = qkv[:, emb:2 * emb]
        v = qkv[:, 2 * emb:]
    else:
        # Single stacked weight stream; leading-dim indexing (no lane slicing).
        q = jnp.dot(a, w_ref[0], preferred_element_type=jnp.float32) + bias_ref[0]
        k = jnp.dot(a, w_ref[1], preferred_element_type=jnp.float32) + bias_ref[1]
        v = jnp.dot(a, w_ref[2], preferred_element_type=jnp.float32) + bias_ref[2]
    q_ref[...] = (q * jnp.float32(q_scale)).astype(q_ref.dtype)
    k_ref[...] = k.astype(k_ref.dtype)
    v_ref[...] = v.astype(v_ref.dtype)


def _flash_attn_kernel(q_ref, k_ref, v_ref, o_ref, m_sc, l_sc, acc_sc, *, tq, tk):
    """Flash attention, grid=(B*H, q-tiles, k-tiles); causal mask built in-kernel,
    fully-masked tiles above the diagonal skipped."""
    qi = pl.program_id(1)
    kv = pl.program_id(2)

    @pl.when(kv == 0)
    def _():
        m_sc[...] = jnp.full(m_sc.shape, _NEG_BIG, dtype=jnp.float32)
        l_sc[...] = jnp.zeros_like(l_sc)
        acc_sc[...] = jnp.zeros_like(acc_sc)

    # Only compute when the k tile intersects the causal window (k_start <= q_end).
    @pl.when(kv * tk < (qi + 1) * tq)
    def _():
        q = q_ref[0]                                   # (tq, Dh) bf16 (pre-scaled)
        k = k_ref[0]                                   # (tk, Dh) bf16
        s = jax.lax.dot_general(q, k, (((1,), (1,)), ((), ())),
                                preferred_element_type=jnp.float32)
        row = qi * tq + jax.lax.broadcasted_iota(jnp.int32, (tq, tk), 0)
        col = kv * tk + jax.lax.broadcasted_iota(jnp.int32, (tq, tk), 1)
        s = jnp.where(row >= col, s, jnp.float32(_NEG_BIG))

        m_prev = m_sc[...]
        m_new = jnp.maximum(m_prev, jnp.max(s, axis=-1, keepdims=True))
        alpha = jnp.exp(m_prev - m_new)
        p = jnp.exp(s - m_new)
        l_sc[...] = alpha * l_sc[...] + jnp.sum(p, axis=-1, keepdims=True)
        acc_sc[...] = alpha * acc_sc[...] + jnp.dot(
            p.astype(jnp.bfloat16), v_ref[0], preferred_element_type=jnp.float32)
        m_sc[...] = m_new

    @pl.when(kv == pl.num_programs(2) - 1)
    def _():
        inv = pl.reciprocal(l_sc[...], approx=True)    # EUP slot, frees VALU
        o_ref[0] = (acc_sc[...] * inv).astype(o_ref.dtype)


def _post_attn_ffn_kernel(x_ref, ctx_ref, wo_ref, bo_ref, ln2g_ref, ln2b_ref,
                          w1_ref, b1_ref, w2_ref, b2_ref, o_ref,
                          xres_sc, fln_sc, acc_sc, *, eps):
    """Out-proj + residual + LN2 + GELU FFN (F-tiled) + residual.
    grid = (row tiles, F tiles); FFN output accumulated in f32 VMEM scratch."""
    fi = pl.program_id(1)

    @pl.when(fi == 0)
    def _():
        attn = jnp.dot(ctx_ref[...], wo_ref[...],
                       preferred_element_type=jnp.float32) + bo_ref[...]
        xres = x_ref[...] + attn                       # residual (dropout p=0.0)
        xres_sc[...] = xres
        fln_sc[...] = _layernorm(xres, ln2g_ref[...], ln2b_ref[...],
                                 eps).astype(jnp.bfloat16)
        acc_sc[...] = jnp.zeros_like(acc_sc)

    h = jnp.dot(fln_sc[...], w1_ref[...],
                preferred_element_type=jnp.float32) + b1_ref[...]
    h = _gelu_exact(h).astype(jnp.bfloat16)            # GELU on (tr, tf) chunk only
    acc_sc[...] += jnp.dot(h, w2_ref[...], preferred_element_type=jnp.float32)

    @pl.when(fi == pl.num_programs(1) - 1)
    def _():
        o_ref[...] = xres_sc[...] + acc_sc[...] + b2_ref[...]


def _matmul_kernel(x_ref, w_ref, o_ref, acc_ref):
    """Tiled (M,N,K) matmul with f32 VMEM accumulator (vocab projection).
    The activation tile is cast to bf16 in-kernel (no standalone XLA cast)."""
    @pl.when(pl.program_id(2) == 0)
    def _():
        acc_ref[...] = jnp.zeros_like(acc_ref)
    acc_ref[...] += jnp.dot(x_ref[...].astype(jnp.bfloat16), w_ref[...],
                            preferred_element_type=jnp.float32)

    @pl.when(pl.program_id(2) == pl.num_programs(2) - 1)
    def _():
        o_ref[...] = acc_ref[...].astype(o_ref.dtype)


# ----------------------------- wrappers (glue) ---------------------------------

def _ln_qkv(x2, lp, eps, cfg, q_scale):
    R, E = x2.shape
    tr, Rp = _row_tiling(R, cfg['row_tile'])
    xp = x2 if Rp == R else jnp.pad(x2, ((0, Rp - R), (0, 0)))
    fused = (lp['wqkv_t'].ndim == 2)
    grid = (Rp // tr,)
    rows = pl.BlockSpec((tr, E), lambda i: (i, 0))
    vec_e = pl.BlockSpec((1, E), lambda i: (0, 0))
    if fused:
        w_spec = pl.BlockSpec((E, 3 * E), lambda i: (0, 0))
        b_spec = pl.BlockSpec((1, 3 * E), lambda i: (0, 0))
    else:
        w_spec = pl.BlockSpec((3, E, E), lambda i: (0, 0, 0))
        b_spec = pl.BlockSpec((3, 1, E), lambda i: (0, 0, 0))
    kernel = functools.partial(_ln_qkv_kernel, eps=eps, emb=E,
                               fused=fused, q_scale=q_scale)
    q, k, v = pl.pallas_call(
        kernel,
        out_shape=[jax.ShapeDtypeStruct((Rp, E), jnp.bfloat16)] * 3,
        grid=grid,
        in_specs=[rows, vec_e, vec_e, w_spec, b_spec],
        out_specs=[rows, rows, rows],
        compiler_params=pltpu.CompilerParams(
            dimension_semantics=("parallel",),
            vmem_limit_bytes=cfg['vmem']),
    )(xp, lp['ln1_g'], lp['ln1_b'], lp['wqkv_t'], lp['bqkv'])
    if Rp != R:
        q, k, v = q[:R], k[:R], v[:R]
    return q, k, v


def _flash_attention(q, k, v, ts, cfg):
    BH, Sp, Dh = q.shape
    grid = (BH, Sp // ts, Sp // ts)
    kernel = functools.partial(_flash_attn_kernel, tq=ts, tk=ts)
    return pl.pallas_call(
        kernel,
        out_shape=jax.ShapeDtypeStruct((BH, Sp, Dh), jnp.bfloat16),
        grid=grid,
        in_specs=[
            pl.BlockSpec((1, ts, Dh), lambda b, i, j: (b, i, 0)),
            pl.BlockSpec((1, ts, Dh), lambda b, i, j: (b, j, 0)),
            pl.BlockSpec((1, ts, Dh), lambda b, i, j: (b, j, 0)),
        ],
        out_specs=pl.BlockSpec((1, ts, Dh), lambda b, i, j: (b, i, 0)),
        scratch_shapes=[
            pltpu.VMEM((ts, 1), jnp.float32),    # running max
            pltpu.VMEM((ts, 1), jnp.float32),    # running denom
            pltpu.VMEM((ts, Dh), jnp.float32),   # output accumulator
        ],
        compiler_params=pltpu.CompilerParams(
            dimension_semantics=("parallel", "parallel", "arbitrary"),
            vmem_limit_bytes=cfg['vmem']),
    )(q, k, v)


def _post_attn_ffn(x2, ctx2, lp, eps, cfg):
    R, E = x2.shape
    F = lp['w1_t'].shape[1]
    tr, Rp = _row_tiling(R, cfg['row_tile'])
    if Rp != R:
        x2p = jnp.pad(x2, ((0, Rp - R), (0, 0)))
        ctxp = jnp.pad(ctx2, ((0, Rp - R), (0, 0)))
    else:
        x2p, ctxp = x2, ctx2
    tf = _pick_tile(F, cfg['ffn_tile'], 128)
    grid = (Rp // tr, F // tf)
    rows = pl.BlockSpec((tr, E), lambda i, fi: (i, 0))
    vec_e = pl.BlockSpec((1, E), lambda i, fi: (0, 0))
    w_ee = pl.BlockSpec((E, E), lambda i, fi: (0, 0))
    w1_s = pl.BlockSpec((E, tf), lambda i, fi: (0, fi))
    b1_s = pl.BlockSpec((1, tf), lambda i, fi: (0, fi))
    w2_s = pl.BlockSpec((tf, E), lambda i, fi: (fi, 0))
    kernel = functools.partial(_post_attn_ffn_kernel, eps=eps)
    out = pl.pallas_call(
        kernel,
        out_shape=jax.ShapeDtypeStruct((Rp, E), jnp.float32),
        grid=grid,
        in_specs=[rows, rows, w_ee, vec_e, vec_e, vec_e, w1_s, b1_s, w2_s, vec_e],
        out_specs=rows,
        scratch_shapes=[pltpu.VMEM((tr, E), jnp.float32),    # x + attn residual
                        pltpu.VMEM((tr, E), jnp.bfloat16),   # LN2(x) in bf16
                        pltpu.VMEM((tr, E), jnp.float32)],   # FFN accumulator
        input_output_aliases={0: 0},      # residual stream updated in place
        compiler_params=pltpu.CompilerParams(
            dimension_semantics=("parallel", "arbitrary"),
            vmem_limit_bytes=cfg['vmem']),
    )(x2p, ctxp, lp['wo_t'], lp['bo'], lp['ln2_g'], lp['ln2_b'],
      lp['w1_t'], lp['b1'], lp['w2_t'], lp['b2'])
    return out if Rp == R else out[:R]


def final_linear(x_rows, w_out_t, cfg):
    """Vocab projection for a small set of rows (last token per sequence)."""
    Rows, E = x_rows.shape
    V = w_out_t.shape[1]
    Vp = _round_up(V, cfg['vocab_tile'])       # lane-dense, tile-divisible N
    w = w_out_t if Vp == V else jnp.pad(w_out_t, ((0, 0), (0, Vp - V)))
    tm, Rp = _row_tiling(Rows, cfg['row_tile'])
    xp = x_rows if Rp == Rows else jnp.pad(x_rows, ((0, Rp - Rows), (0, 0)))
    tn = _pick_tile(Vp, cfg['vocab_tile'], 128)
    tk = _pick_tile(E, cfg['k_tile'], 128)
    grid = (Rp // tm, Vp // tn, E // tk)
    logits = pl.pallas_call(
        _matmul_kernel,
        out_shape=jax.ShapeDtypeStruct((Rp, Vp), jnp.float32),
        grid=grid,
        in_specs=[pl.BlockSpec((tm, tk), lambda i, j, k: (i, k)),
                  pl.BlockSpec((tk, tn), lambda i, j, k: (k, j))],
        out_specs=pl.BlockSpec((tm, tn), lambda i, j, k: (i, j)),
        scratch_shapes=[pltpu.VMEM((tm, tn), jnp.float32)],
        compiler_params=pltpu.CompilerParams(
            dimension_semantics=("parallel", "parallel", "arbitrary"),
            vmem_limit_bytes=cfg['vmem']),
    )(xp, w)
    return logits[:Rows, :V]


def decoder_layer(x2, lp, *, batch, seq_pad, seq_tile, num_heads, cfg, eps):
    R, E = x2.shape
    head_dim = E // num_heads

    q, k, v = _ln_qkv(x2, lp, eps, cfg, q_scale=1.0 / math.sqrt(head_dim))

    # Head-major layout plumbing in the wrapper (bf16 HBM transposes).
    def split_heads(t):
        return (t.reshape(batch, seq_pad, num_heads, head_dim)
                 .transpose(0, 2, 1, 3)
                 .reshape(batch * num_heads, seq_pad, head_dim))

    ctx = _flash_attention(split_heads(q), split_heads(k), split_heads(v),
                           seq_tile, cfg)
    ctx = (ctx.reshape(batch, num_heads, seq_pad, head_dim)
              .transpose(0, 2, 1, 3)
              .reshape(R, E))

    return _post_attn_ffn(x2, ctx, lp, eps, cfg)


def gpt_forward(params, tokens, *, num_heads, layer_eps=1e-5):
    """Mirrors GPT.forward with y=None (causal self-attention mask built in-kernel):
    returns (None, logits[:, [-1], :])."""
    B, S = tokens.shape
    E = params['tok_emb'].shape[1]
    cfg = _tpu_config()
    ts, S_pad = _seq_tiling(S, cfg['seq_tile'])

    x = params['tok_emb'][tokens] + params['pos_emb'][:S][None, :, :]
    if S_pad != S:
        x = jnp.pad(x, ((0, 0), (0, S_pad - S), (0, 0)))
    x2 = x.reshape(B * S_pad, E).astype(jnp.float32)

    for lp in params['layers']:
        x2 = decoder_layer(x2, lp, batch=B, seq_pad=S_pad, seq_tile=ts,
                           num_heads=num_heads, cfg=cfg, eps=layer_eps)

    # Vocab projection only for the last real token of each sequence.
    x_last = x2.reshape(B, S_pad, E)[:, S - 1, :]
    logits = final_linear(x_last, params['w_out_t'], cfg)      # (B, V)
    pred = logits[:, None, :]                                   # x[:, [-1], :]
    return None, pred


# ----------------------------- parameters --------------------------------------

def init_params(key, vocab_size, embedding_dim, ffn_dim, num_heads, T, N):
    E, F = embedding_dim, ffn_dim
    keys = jax.random.split(key, 3 + N)

    def nrm(k, shape, scale=0.02):
        return scale * jax.random.normal(k, shape, dtype=jnp.float32)

    params = {
        'tok_emb': nrm(keys[0], (vocab_size, E), 1.0),
        'pos_emb': nrm(keys[1], (T, E), 1.0),
        'w_out_t': nrm(keys[2], (E, vocab_size)),
        'layers': [],
    }
    for i in range(N):
        lk = jax.random.split(keys[3 + i], 16)
        params['layers'].append({
            'ln1_g': 1.0 + 0.1 * jax.random.normal(lk[0], (1, E), jnp.float32),
            'ln1_b': 0.1 * jax.random.normal(lk[1], (1, E), jnp.float32),
            'wq_t': nrm(lk[2], (E, E)),
            'wk_t': nrm(lk[3], (E, E)),
            'wv_t': nrm(lk[4], (E, E)),
            'bq': nrm(lk[5], (1, E)),
            'bk': nrm(lk[6], (1, E)),
            'bv': nrm(lk[7], (1, E)),
            'wo_t': nrm(lk[8], (E, E)),
            'bo': nrm(lk[9], (1, E)),
            'ln2_g': 1.0 + 0.1 * jax.random.normal(lk[10], (1, E), jnp.float32),
            'ln2_b': 0.1 * jax.random.normal(lk[11], (1, E), jnp.float32),
            'w1_t': nrm(lk[12], (E, F)),
            'b1': nrm(lk[13], (1, F)),
            'w2_t': nrm(lk[14], (F, E)),
            'b2': nrm(lk[15], (1, E)),
        })
    return params


def prepare_params(params):
    """Fuse QKV weights into one stream, cast MXU weights to bf16; keep LN params,
    biases, and embeddings in f32."""
    E = params['tok_emb'].shape[1]
    fused = (E % 128 == 0)
    layers = []
    for lp in params['layers']:
        if fused:
            wqkv = jnp.concatenate([lp['wq_t'], lp['wk_t'], lp['wv_t']], axis=1)
            bqkv = jnp.concatenate([lp['bq'], lp['bk'], lp['bv']], axis=1)
        else:
            wqkv = jnp.stack([lp['wq_t'], lp['wk_t'], lp['wv_t']], axis=0)
            bqkv = jnp.stack([lp['bq'], lp['bk'], lp['bv']], axis=0)
        layers.append({
            'ln1_g': lp['ln1_g'], 'ln1_b': lp['ln1_b'],
            'wqkv_t': wqkv.astype(jnp.bfloat16),
            'bqkv': bqkv,
            'wo_t': lp['wo_t'].astype(jnp.bfloat16), 'bo': lp['bo'],
            'ln2_g': lp['ln2_g'], 'ln2_b': lp['ln2_b'],
            'w1_t': lp['w1_t'].astype(jnp.bfloat16), 'b1': lp['b1'],
            'w2_t': lp['w2_t'].astype(jnp.bfloat16), 'b2': lp['b2'],
        })
    return {
        'tok_emb': params['tok_emb'],
        'pos_emb': params['pos_emb'],
        'w_out_t': params['w_out_t'].astype(jnp.bfloat16),
        'layers': layers,
    }


# ----------------------------- pure-JAX reference ------------------------------

def ref_forward(params, tokens, mask, *, num_heads, layer_eps=1e-5):
    B, S = tokens.shape
    x = params['tok_emb'][tokens] + params['pos_emb'][:S][None]

    def ln(v, g, b):
        mu = jnp.mean(v, axis=-1, keepdims=True)
        var = jnp.mean((v - mu) ** 2, axis=-1, keepdims=True)
        return (v - mu) / jnp.sqrt(var + layer_eps) * g + b

    for lp in params['layers']:
        E = x.shape[-1]
        Dh = E // num_heads
        a = ln(x, lp['ln1_g'], lp['ln1_b'])
        q = a @ lp['wq_t'] + lp['bq']
        k = a @ lp['wk_t'] + lp['bk']
        v = a @ lp['wv_t'] + lp['bv']
        qh = q.reshape(B, S, num_heads, Dh).transpose(0, 2, 1, 3)
        kh = k.reshape(B, S, num_heads, Dh).transpose(0, 2, 1, 3)
        vh = v.reshape(B, S, num_heads, Dh).transpose(0, 2, 1, 3)
        s = jnp.einsum('bhqd,bhkd->bhqk', qh, kh) / jnp.sqrt(Dh) + mask
        p = jax.nn.softmax(s, axis=-1)
        ctx = jnp.einsum('bhqk,bhkd->bhqd', p, vh)
        ctx = ctx.transpose(0, 2, 1, 3).reshape(B, S, E)
        x = x + ctx @ lp['wo_t'] + lp['bo']
        f = ln(x, lp['ln2_g'], lp['ln2_b'])
        h = jax.nn.gelu(f @ lp['w1_t'] + lp['b1'], approximate=False)
        x = x + h @ lp['w2_t'] + lp['b2']
    logits = x @ params['w_out_t']
    return logits[:, -1:, :]


# ----------------------------- main ---------------------------------------------

if __name__ == "__main__":
    vocab_size, E, F, H = 64, 32, 64, 4
    T, N = 128, 2
    B, S = 2, 8

    key = jax.random.PRNGKey(0)
    pkey, tkey = jax.random.split(key)
    params = init_params(pkey, vocab_size, E, F, H, T, N)
    tokens = jax.random.randint(tkey, (B, S), 0, vocab_size, dtype=jnp.int32)

    kparams = prepare_params(params)
    fwd = jax.jit(functools.partial(gpt_forward, num_heads=H))
    _, pred = fwd(kparams, tokens)
    pred = jax.block_until_ready(pred)

    # Reference uses the explicit causal mask as produced by GPT.create_mask.
    causal = jnp.tril(jnp.ones((S, S), dtype=bool))
    mask = jnp.where(causal, 0.0, -jnp.inf).astype(jnp.float32)
    ref = ref_forward(params, tokens, mask, num_heads=H)

    assert pred.shape == (B, 1, vocab_size), pred.shape
    err = float(jnp.max(jnp.abs(pred - ref)))
    # Tolerance relaxed (deliberately) vs the pure-f32 path: matmuls use bf16
    # inputs with f32 accumulation.
    assert err < 3e-2, f"kernel/reference mismatch: {err}"

    print("KERNEL_OK")
</pallas_src>

<mosaic_0001>
module attributes {stable_mosaic.version = 11 : i64} {
  func.func @_ln_qkv_kernel(%arg0: i32, %arg1: memref<16x32xf32, #tpu.memory_space<vmem>>, %arg2: memref<1x32xf32, #tpu.memory_space<vmem>>, %arg3: memref<1x32xf32, #tpu.memory_space<vmem>>, %arg4: memref<3x32x32xbf16, #tpu.memory_space<vmem>>, %arg5: memref<3x1x32xf32, #tpu.memory_space<vmem>>, %arg6: memref<16x32xbf16, #tpu.memory_space<vmem>>, %arg7: memref<16x32xbf16, #tpu.memory_space<vmem>>, %arg8: memref<16x32xbf16, #tpu.memory_space<vmem>>) attributes {dimension_semantics = [#tpu.dimension_semantics<parallel>], iteration_bounds = array<i64: 1>, scalar_prefetch = 0 : i64, scratch_operands = 0 : i64, tpu.core_type = #tpu.core_type<tc>, window_params = [{transform_indices = @transform_0, window_bounds = array<i64: 16, 32>}, {pipeline_mode = #tpu.pipeline_mode<synchronous>, transform_indices = @transform_1, window_bounds = array<i64: 1, 32>}, {pipeline_mode = #tpu.pipeline_mode<synchronous>, transform_indices = @transform_2, window_bounds = array<i64: 1, 32>}, {pipeline_mode = #tpu.pipeline_mode<synchronous>, transform_indices = @transform_3, window_bounds = array<i64: 3, 32, 32>}, {pipeline_mode = #tpu.pipeline_mode<synchronous>, transform_indices = @transform_4, window_bounds = array<i64: 3, 1, 32>}, {transform_indices = @transform_5, window_bounds = array<i64: 16, 32>}, {transform_indices = @transform_6, window_bounds = array<i64: 16, 32>}, {transform_indices = @transform_7, window_bounds = array<i64: 16, 32>}]} {
    %c0 = arith.constant 0 : index
    %c0_0 = arith.constant 0 : index
    %0 = vector.load %arg1[%c0, %c0_0] : memref<16x32xf32, #tpu.memory_space<vmem>>, vector<16x32xf32>
    %c0_1 = arith.constant 0 : index
    %c0_2 = arith.constant 0 : index
    %1 = vector.load %arg2[%c0_1, %c0_2] : memref<1x32xf32, #tpu.memory_space<vmem>>, vector<1x32xf32>
    %c0_3 = arith.constant 0 : index
    %c0_4 = arith.constant 0 : index
    %2 = vector.load %arg3[%c0_3, %c0_4] : memref<1x32xf32, #tpu.memory_space<vmem>>, vector<1x32xf32>
    %cst = arith.constant dense<0.000000e+00> : vector<16xf32>
    %3 = vector.multi_reduction <add>, %0, %cst [1] : vector<16x32xf32> to vector<16xf32>
    %4 = vector.shape_cast %3 : vector<16xf32> to vector<16x1xf32>
    %cst_5 = arith.constant 3.200000e+01 : f32
    %5 = vector.broadcast %cst_5 : f32 to vector<16x1xf32>
    %6 = arith.divf %4, %5 : vector<16x1xf32>
    %7 = vector.broadcast %6 : vector<16x1xf32> to vector<16x32xf32>
    %8 = arith.subf %0, %7 : vector<16x32xf32>
    %9 = arith.mulf %8, %8 : vector<16x32xf32>
    %cst_6 = arith.constant dense<0.000000e+00> : vector<16xf32>
    %10 = vector.multi_reduction <add>, %9, %cst_6 [1] : vector<16x32xf32> to vector<16xf32>
    %11 = vector.shape_cast %10 : vector<16xf32> to vector<16x1xf32>
    %cst_7 = arith.constant 3.200000e+01 : f32
    %12 = vector.broadcast %cst_7 : f32 to vector<16x1xf32>
    %13 = arith.divf %11, %12 : vector<16x1xf32>
    %14 = vector.broadcast %6 : vector<16x1xf32> to vector<16x32xf32>
    %15 = arith.subf %0, %14 : vector<16x32xf32>
    %cst_8 = arith.constant 9.99999974E-6 : f32
    %16 = vector.broadcast %cst_8 : f32 to vector<16x1xf32>
    %17 = arith.addf %13, %16 : vector<16x1xf32>
    %18 = math.rsqrt %17 : vector<16x1xf32>
    %19 = vector.broadcast %18 : vector<16x1xf32> to vector<16x32xf32>
    %20 = arith.mulf %15, %19 : vector<16x32xf32>
    %21 = vector.broadcast %1 : vector<1x32xf32> to vector<16x32xf32>
    %22 = arith.mulf %20, %21 : vector<16x32xf32>
    %23 = vector.broadcast %2 : vector<1x32xf32> to vector<16x32xf32>
    %24 = arith.addf %22, %23 : vector<16x32xf32>
    %25 = arith.truncf %24 : vector<16x32xf32> to vector<16x32xbf16>
    %c0_9 = arith.constant 0 : index
    %c0_10 = arith.constant 0 : index
    %c0_11 = arith.constant 0 : index
    %26 = vector.load %arg4[%c0_9, %c0_10, %c0_11] : memref<3x32x32xbf16, #tpu.memory_space<vmem>>, vector<1x32x32xbf16>
    %27 = vector.shape_cast %26 : vector<1x32x32xbf16> to vector<32x32xbf16>
    %cst_12 = arith.constant dense<0.000000e+00> : vector<16x32xf32>
    %28 = tpu.matmul %25, %27, %cst_12 {dimension_numbers = #tpu.dot_dimension_numbers<[1], [0], [0], [1], [0, 0, 1, 1], [], []>} : vector<16x32xbf16>, vector<32x32xbf16>, vector<16x32xf32> -> vector<16x32xf32>
    %c0_13 = arith.constant 0 : index
    %c0_14 = arith.constant 0 : index
    %c0_15 = arith.constant 0 : index
    %29 = vector.load %arg5[%c0_13, %c0_14, %c0_15] : memref<3x1x32xf32, #tpu.memory_space<vmem>>, vector<1x1x32xf32>
    %30 = vector.shape_cast %29 : vector<1x1x32xf32> to vector<1x32xf32>
    %31 = vector.broadcast %30 : vector<1x32xf32> to vector<16x32xf32>
    %32 = arith.addf %28, %31 : vector<16x32xf32>
    %c1 = arith.constant 1 : index
    %c0_16 = arith.constant 0 : index
    %c0_17 = arith.constant 0 : index
    %33 = vector.load %arg4[%c1, %c0_16, %c0_17] : memref<3x32x32xbf16, #tpu.memory_space<vmem>>, vector<1x32x32xbf16>
    %34 = vector.shape_cast %33 : vector<1x32x32xbf16> to vector<32x32xbf16>
    %cst_18 = arith.constant dense<0.000000e+00> : vector<16x32xf32>
    %35 = tpu.matmul %25, %34, %cst_18 {dimension_numbers = #tpu.dot_dimension_numbers<[1], [0], [0], [1], [0, 0, 1, 1], [], []>} : vector<16x32xbf16>, vector<32x32xbf16>, vector<16x32xf32> -> vector<16x32xf32>
    %c1_19 = arith.constant 1 : index
    %c0_20 = arith.constant 0 : index
    %c0_21 = arith.constant 0 : index
    %36 = vector.load %arg5[%c1_19, %c0_20, %c0_21] : memref<3x1x32xf32, #tpu.memory_space<vmem>>, vector<1x1x32xf32>
    %37 = vector.shape_cast %36 : vector<1x1x32xf32> to vector<1x32xf32>
    %38 = vector.broadcast %37 : vector<1x32xf32> to vector<16x32xf32>
    %39 = arith.addf %35, %38 : vector<16x32xf32>
    %c2 = arith.constant 2 : index
    %c0_22 = arith.constant 0 : index
    %c0_23 = arith.constant 0 : index
    %40 = vector.load %arg4[%c2, %c0_22, %c0_23] : memref<3x32x32xbf16, #tpu.memory_space<vmem>>, vector<1x32x32xbf16>
    %41 = vector.shape_cast %40 : vector<1x32x32xbf16> to vector<32x32xbf16>
    %cst_24 = arith.constant dense<0.000000e+00> : vector<16x32xf32>
    %42 = tpu.matmul %25, %41, %cst_24 {dimension_numbers = #tpu.dot_dimension_numbers<[1], [0], [0], [1], [0, 0, 1, 1], [], []>} : vector<16x32xbf16>, vector<32x32xbf16>, vector<16x32xf32> -> vector<16x32xf32>
    %c2_25 = arith.constant 2 : index
    %c0_26 = arith.constant 0 : index
    %c0_27 = arith.constant 0 : index
    %43 = vector.load %arg5[%c2_25, %c0_26, %c0_27] : memref<3x1x32xf32, #tpu.memory_space<vmem>>, vector<1x1x32xf32>
    %44 = vector.shape_cast %43 : vector<1x1x32xf32> to vector<1x32xf32>
    %45 = vector.broadcast %44 : vector<1x32xf32> to vector<16x32xf32>
    %46 = arith.addf %42, %45 : vector<16x32xf32>
    %cst_28 = arith.constant 0.353553385 : f32
    %47 = vector.broadcast %cst_28 : f32 to vector<16x32xf32>
    %48 = arith.mulf %32, %47 : vector<16x32xf32>
    %49 = arith.truncf %48 : vector<16x32xf32> to vector<16x32xbf16>
    %c0_29 = arith.constant 0 : index
    %c0_30 = arith.constant 0 : index
    %50 = vector.load %arg6[%c0_29, %c0_30] : memref<16x32xbf16, #tpu.memory_space<vmem>>, vector<16x32xbf16>
    tpu.vector_store %arg6[%c0_29, %c0_30], %49 {strides = array<i32>} : memref<16x32xbf16, #tpu.memory_space<vmem>>, vector<16x32xbf16>,
    %51 = arith.truncf %39 : vector<16x32xf32> to vector<16x32xbf16>
    %c0_31 = arith.constant 0 : index
    %c0_32 = arith.constant 0 : index
    %52 = vector.load %arg7[%c0_31, %c0_32] : memref<16x32xbf16, #tpu.memory_space<vmem>>, vector<16x32xbf16>
    tpu.vector_store %arg7[%c0_31, %c0_32], %51 {strides = array<i32>} : memref<16x32xbf16, #tpu.memory_space<vmem>>, vector<16x32xbf16>,
    %53 = arith.truncf %46 : vector<16x32xf32> to vector<16x32xbf16>
    %c0_33 = arith.constant 0 : index
    %c0_34 = arith.constant 0 : index
    %54 = vector.load %arg8[%c0_33, %c0_34] : memref<16x32xbf16, #tpu.memory_space<vmem>>, vector<16x32xbf16>
    tpu.vector_store %arg8[%c0_33, %c0_34], %53 {strides = array<i32>} : memref<16x32xbf16, #tpu.memory_space<vmem>>, vector<16x32xbf16>,
    return
  }
  func.func @transform_0(%arg0: i32) -> (i32, i32) {
    %c0_i32 = arith.constant 0 : i32
    %c0_i32_0 = arith.constant 0 : i32
    return %arg0, %c0_i32 : i32, i32
  }
  func.func @transform_1(%arg0: i32) -> (i32, i32) {
    %c0_i32 = arith.constant 0 : i32
    %c0_i32_0 = arith.constant 0 : i32
    %c0_i32_1 = arith.constant 0 : i32
    return %c0_i32, %c0_i32_0 : i32, i32
  }
  func.func @transform_2(%arg0: i32) -> (i32, i32) {
    %c0_i32 = arith.constant 0 : i32
    %c0_i32_0 = arith.constant 0 : i32
    %c0_i32_1 = arith.constant 0 : i32
    return %c0_i32, %c0_i32_0 : i32, i32
  }
  func.func @transform_3(%arg0: i32) -> (i32, i32, i32) {
    %c0_i32 = arith.constant 0 : i32
    %c0_i32_0 = arith.constant 0 : i32
    %c0_i32_1 = arith.constant 0 : i32
    %c0_i32_2 = arith.constant 0 : i32
    return %c0_i32, %c0_i32_0, %c0_i32_1 : i32, i32, i32
  }
  func.func @transform_4(%arg0: i32) -> (i32, i32, i32) {
    %c0_i32 = arith.constant 0 : i32
    %c0_i32_0 = arith.constant 0 : i32
    %c0_i32_1 = arith.constant 0 : i32
    %c0_i32_2 = arith.constant 0 : i32
    return %c0_i32, %c0_i32_0, %c0_i32_1 : i32, i32, i32
  }
  func.func @transform_5(%arg0: i32) -> (i32, i32) {
    %c0_i32 = arith.constant 0 : i32
    %c0_i32_0 = arith.constant 0 : i32
    return %arg0, %c0_i32 : i32, i32
  }
  func.func @transform_6(%arg0: i32) -> (i32, i32) {
    %c0_i32 = arith.constant 0 : i32
    %c0_i32_0 = arith.constant 0 : i32
    return %arg0, %c0_i32 : i32, i32
  }
  func.func @transform_7(%arg0: i32) -> (i32, i32) {
    %c0_i32 = arith.constant 0 : i32
    %c0_i32_0 = arith.constant 0 : i32
    return %arg0, %c0_i32 : i32, i32
  }
}

module attributes {stable_mosaic.version = 11 : i64} {
  func.func @_flash_attn_kernel(%arg0: i32, %arg1: i32, %arg2: i32, %arg3: memref<1x8x8xbf16, #tpu.memory_space<vmem>>, %arg4: memref<1x8x8xbf16, #tpu.memory_space<vmem>>, %arg5: memref<1x8x8xbf16, #tpu.memory_space<vmem>>, %arg6: memref<1x8x8xbf16, #tpu.memory_space<vmem>>, %arg7: memref<8x1xf32, #tpu.memory_space<vmem>>, %arg8: memref<8x1xf32, #tpu.memory_space<vmem>>, %arg9: memref<8x8xf32, #tpu.memory_space<vmem>>) attributes {dimension_semantics = [#tpu.dimension_semantics<parallel>, #tpu.dimension_semantics<parallel>, #tpu.dimension_semantics<arbitrary>], iteration_bounds = array<i64: 8, 1, 1>, scalar_prefetch = 0 : i64, scratch_operands = 3 : i64, tpu.core_type = #tpu.core_type<tc>, window_params = [{transform_indices = @transform_0, window_bounds = array<i64: 1, 8, 8>}, {transform_indices = @transform_1, window_bounds = array<i64: 1, 8, 8>}, {transform_indices = @transform_2, window_bounds = array<i64: 1, 8, 8>}, {transform_indices = @transform_3, window_bounds = array<i64: 1, 8, 8>}]} {
    %c0_i32 = arith.constant 0 : i32
    %0 = arith.cmpi eq, %arg2, %c0_i32 : i32
    %1 = arith.extui %0 : i1 to i32
    %c0_i32_0 = arith.constant 0 : i32
    %2 = arith.cmpi ne, %1, %c0_i32_0 : i32
    scf.if %2 {
      %cst = arith.constant -1.000000e+30 : f32
      %12 = vector.broadcast %cst : f32 to vector<8x1xf32>
      %c0 = arith.constant 0 : index
      %c0_5 = arith.constant 0 : index
      %13 = vector.load %arg7[%c0, %c0_5] : memref<8x1xf32, #tpu.memory_space<vmem>>, vector<8x1xf32>
      tpu.vector_store %arg7[%c0, %c0_5], %12 {strides = array<i32>} : memref<8x1xf32, #tpu.memory_space<vmem>>, vector<8x1xf32>,
      %cst_6 = arith.constant 0.000000e+00 : f32
      %14 = vector.broadcast %cst_6 : f32 to vector<8x1xf32>
      %c0_7 = arith.constant 0 : index
      %c0_8 = arith.constant 0 : index
      %15 = vector.load %arg8[%c0_7, %c0_8] : memref<8x1xf32, #tpu.memory_space<vmem>>, vector<8x1xf32>
      tpu.vector_store %arg8[%c0_7, %c0_8], %14 {strides = array<i32>} : memref<8x1xf32, #tpu.memory_space<vmem>>, vector<8x1xf32>,
      %cst_9 = arith.constant 0.000000e+00 : f32
      %16 = vector.broadcast %cst_9 : f32 to vector<8x8xf32>
      %c0_10 = arith.constant 0 : index
      %c0_11 = arith.constant 0 : index
      %17 = vector.load %arg9[%c0_10, %c0_11] : memref<8x8xf32, #tpu.memory_space<vmem>>, vector<8x8xf32>
      tpu.vector_store %arg9[%c0_10, %c0_11], %16 {strides = array<i32>} : memref<8x8xf32, #tpu.memory_space<vmem>>, vector<8x8xf32>,
    } else {
    }
    %c8_i32 = arith.constant 8 : i32
    %3 = arith.muli %arg2, %c8_i32 : i32
    %c1_i32 = arith.constant 1 : i32
    %4 = arith.addi %arg1, %c1_i32 : i32
    %c8_i32_1 = arith.constant 8 : i32
    %5 = arith.muli %4, %c8_i32_1 : i32
    %6 = arith.cmpi slt, %3, %5 : i32
    %7 = arith.extui %6 : i1 to i32
    %c0_i32_2 = arith.constant 0 : i32
    %8 = arith.cmpi ne, %7, %c0_i32_2 : i32
    scf.if %8 {
      %c0 = arith.constant 0 : index
      %c0_5 = arith.constant 0 : index
      %c0_6 = arith.constant 0 : index
      %12 = vector.load %arg3[%c0, %c0_5, %c0_6] : memref<1x8x8xbf16, #tpu.memory_space<vmem>>, vector<1x8x8xbf16>
      %13 = vector.shape_cast %12 : vector<1x8x8xbf16> to vector<8x8xbf16>
      %c0_7 = arith.constant 0 : index
      %c0_8 = arith.constant 0 : index
      %c0_9 = arith.constant 0 : index
      %14 = vector.load %arg4[%c0_7, %c0_8, %c0_9] : memref<1x8x8xbf16, #tpu.memory_space<vmem>>, vector<1x8x8xbf16>
      %15 = vector.shape_cast %14 : vector<1x8x8xbf16> to vector<8x8xbf16>
      %cst = arith.constant dense<0.000000e+00> : vector<8x8xf32>
      %16 = tpu.matmul %13, %15, %cst {dimension_numbers = #tpu.dot_dimension_numbers<[1], [1], [0], [0], [0, 0, 1, 0], [], []>} : vector<8x8xbf16>, vector<8x8xbf16>, vector<8x8xf32> -> vector<8x8xf32>
      %c8_i32_10 = arith.constant 8 : i32
      %17 = arith.muli %arg1, %c8_i32_10 : i32
      %18 = tpu.iota {dimensions = array<i32: 0>} : vector<8x8xi32>
      %19 = vector.broadcast %17 : i32 to vector<8x8xi32>
      %20 = arith.addi %19, %18 : vector<8x8xi32>
      %c8_i32_11 = arith.constant 8 : i32
      %21 = arith.muli %arg2, %c8_i32_11 : i32
      %22 = tpu.iota {dimensions = array<i32: 1>} : vector<8x8xi32>
      %23 = vector.broadcast %21 : i32 to vector<8x8xi32>
      %24 = arith.addi %23, %22 : vector<8x8xi32>
      %25 = arith.cmpi sge, %20, %24 : vector<8x8xi32>
      %cst_12 = arith.constant -1.000000e+30 : f32
      %26 = vector.broadcast %cst_12 : f32 to vector<8x8xf32>
      %27 = arith.select %25, %16, %26 : vector<8x8xi1>, vector<8x8xf32>
      %c0_13 = arith.constant 0 : index
      %c0_14 = arith.constant 0 : index
      %28 = vector.load %arg7[%c0_13, %c0_14] : memref<8x1xf32, #tpu.memory_space<vmem>>, vector<8x1xf32>
      %cst_15 = arith.constant dense<0xFF800000> : vector<8xf32>
      %29 = vector.multi_reduction <maximumf>, %27, %cst_15 [1] : vector<8x8xf32> to vector<8xf32>
      %30 = vector.shape_cast %29 : vector<8xf32> to vector<8x1xf32>
      %31 = arith.maximumf %28, %30 : vector<8x1xf32>
      %32 = arith.subf %28, %31 : vector<8x1xf32>
      %33 = math.exp %32 : vector<8x1xf32>
      %34 = vector.broadcast %31 : vector<8x1xf32> to vector<8x8xf32>
      %35 = arith.subf %27, %34 : vector<8x8xf32>
      %36 = math.exp %35 : vector<8x8xf32>
      %c0_16 = arith.constant 0 : index
      %c0_17 = arith.constant 0 : index
      %37 = vector.load %arg8[%c0_16, %c0_17] : memref<8x1xf32, #tpu.memory_space<vmem>>, vector<8x1xf32>
      %38 = arith.mulf %33, %37 : vector<8x1xf32>
      %cst_18 = arith.constant dense<0.000000e+00> : vector<8xf32>
      %39 = vector.multi_reduction <add>, %36, %cst_18 [1] : vector<8x8xf32> to vector<8xf32>
      %40 = vector.shape_cast %39 : vector<8xf32> to vector<8x1xf32>
      %41 = arith.addf %38, %40 : vector<8x1xf32>
      %c0_19 = arith.constant 0 : index
      %c0_20 = arith.constant 0 : index
      %42 = vector.load %arg8[%c0_19, %c0_20] : memref<8x1xf32, #tpu.memory_space<vmem>>, vector<8x1xf32>
      tpu.vector_store %arg8[%c0_19, %c0_20], %41 {strides = array<i32>} : memref<8x1xf32, #tpu.memory_space<vmem>>, vector<8x1xf32>,
      %c0_21 = arith.constant 0 : index
      %c0_22 = arith.constant 0 : index
      %43 = vector.load %arg9[%c0_21, %c0_22] : memref<8x8xf32, #tpu.memory_space<vmem>>, vector<8x8xf32>
      %44 = vector.broadcast %33 : vector<8x1xf32> to vector<8x8xf32>
      %45 = arith.mulf %44, %43 : vector<8x8xf32>
      %46 = arith.truncf %36 : vector<8x8xf32> to vector<8x8xbf16>
      %c0_23 = arith.constant 0 : index
      %c0_24 = arith.constant 0 : index
      %c0_25 = arith.constant 0 : index
      %47 = vector.load %arg5[%c0_23, %c0_24, %c0_25] : memref<1x8x8xbf16, #tpu.memory_space<vmem>>, vector<1x8x8xbf16>
      %48 = vector.shape_cast %47 : vector<1x8x8xbf16> to vector<8x8xbf16>
      %cst_26 = arith.constant dense<0.000000e+00> : vector<8x8xf32>
      %49 = tpu.matmul %46, %48, %cst_26 {dimension_numbers = #tpu.dot_dimension_numbers<[1], [0], [0], [1], [0, 0, 1, 1], [], []>} : vector<8x8xbf16>, vector<8x8xbf16>, vector<8x8xf32> -> vector<8x8xf32>
      %50 = arith.addf %45, %49 : vector<8x8xf32>
      %c0_27 = arith.constant 0 : index
      %c0_28 = arith.constant 0 : index
      %51 = vector.load %arg9[%c0_27, %c0_28] : memref<8x8xf32, #tpu.memory_space<vmem>>, vector<8x8xf32>
      tpu.vector_store %arg9[%c0_27, %c0_28], %50 {strides = array<i32>} : memref<8x8xf32, #tpu.memory_space<vmem>>, vector<8x8xf32>,
      %c0_29 = arith.constant 0 : index
      %c0_30 = arith.constant 0 : index
      %52 = vector.load %arg7[%c0_29, %c0_30] : memref<8x1xf32, #tpu.memory_space<vmem>>, vector<8x1xf32>
      tpu.vector_store %arg7[%c0_29, %c0_30], %31 {strides = array<i32>} : memref<8x1xf32, #tpu.memory_space<vmem>>, vector<8x1xf32>,
    } else {
    }
    %c0_i32_3 = arith.constant 0 : i32
    %9 = arith.cmpi eq, %arg2, %c0_i32_3 : i32
    %10 = arith.extui %9 : i1 to i32
    %c0_i32_4 = arith.constant 0 : i32
    %11 = arith.cmpi ne, %10, %c0_i32_4 : i32
    scf.if %11 {
      %c0 = arith.constant 0 : index
      %c0_5 = arith.constant 0 : index
      %12 = vector.load %arg8[%c0, %c0_5] : memref<8x1xf32, #tpu.memory_space<vmem>>, vector<8x1xf32>
      %13 = tpu.reciprocal %12 {approx = true} : vector<8x1xf32> -> vector<8x1xf32>
      %c0_6 = arith.constant 0 : index
      %c0_7 = arith.constant 0 : index
      %14 = vector.load %arg9[%c0_6, %c0_7] : memref<8x8xf32, #tpu.memory_space<vmem>>, vector<8x8xf32>
      %15 = vector.broadcast %13 : vector<8x1xf32> to vector<8x8xf32>
      %16 = arith.mulf %14, %15 : vector<8x8xf32>
      %17 = arith.truncf %16 : vector<8x8xf32> to vector<8x8xbf16>
      %c0_8 = arith.constant 0 : index
      %c0_9 = arith.constant 0 : index
      %c0_10 = arith.constant 0 : index
      %18 = vector.load %arg6[%c0_8, %c0_9, %c0_10] : memref<1x8x8xbf16, #tpu.memory_space<vmem>>, vector<1x8x8xbf16>
      %19 = vector.shape_cast %18 : vector<1x8x8xbf16> to vector<8x8xbf16>
      %20 = vector.shape_cast %17 : vector<8x8xbf16> to vector<1x8x8xbf16>
      tpu.vector_store %arg6[%c0_8, %c0_9, %c0_10], %20 {strides = array<i32>} : memref<1x8x8xbf16, #tpu.memory_space<vmem>>, vector<1x8x8xbf16>,
    } else {
    }
    return
  }
  func.func @transform_0(%arg0: i32, %arg1: i32, %arg2: i32) -> (i32, i32, i32) {
    %c0_i32 = arith.constant 0 : i32
    %c0_i32_0 = arith.constant 0 : i32
    return %arg0, %arg1, %c0_i32 : i32, i32, i32
  }
  func.func @transform_1(%arg0: i32, %arg1: i32, %arg2: i32) -> (i32, i32, i32) {
    %c0_i32 = arith.constant 0 : i32
    %c0_i32_0 = arith.constant 0 : i32
    return %arg0, %arg2, %c0_i32 : i32, i32, i32
  }
  func.func @transform_2(%arg0: i32, %arg1: i32, %arg2: i32) -> (i32, i32, i32) {
    %c0_i32 = arith.constant 0 : i32
    %c0_i32_0 = arith.constant 0 : i32
    return %arg0, %arg2, %c0_i32 : i32, i32, i32
  }
  func.func @transform_3(%arg0: i32, %arg1: i32, %arg2: i32) -> (i32, i32, i32) {
    %c0_i32 = arith.constant 0 : i32
    %c0_i32_0 = arith.constant 0 : i32
    return %arg0, %arg1, %c0_i32 : i32, i32, i32
  }
}

module attributes {stable_mosaic.version = 11 : i64} {
  func.func @_post_attn_ffn_kernel(%arg0: i32, %arg1: i32, %arg2: memref<16x32xf32, #tpu.memory_space<vmem>>, %arg3: memref<16x32xbf16, #tpu.memory_space<vmem>>, %arg4: memref<32x32xbf16, #tpu.memory_space<vmem>>, %arg5: memref<1x32xf32, #tpu.memory_space<vmem>>, %arg6: memref<1x32xf32, #tpu.memory_space<vmem>>, %arg7: memref<1x32xf32, #tpu.memory_space<vmem>>, %arg8: memref<32x64xbf16, #tpu.memory_space<vmem>>, %arg9: memref<1x64xf32, #tpu.memory_space<vmem>>, %arg10: memref<64x32xbf16, #tpu.memory_space<vmem>>, %arg11: memref<1x32xf32, #tpu.memory_space<vmem>>, %arg12: memref<16x32xf32, #tpu.memory_space<vmem>>, %arg13: memref<16x32xf32, #tpu.memory_space<vmem>>, %arg14: memref<16x32xbf16, #tpu.memory_space<vmem>>, %arg15: memref<16x32xf32, #tpu.memory_space<vmem>>) attributes {dimension_semantics = [#tpu.dimension_semantics<parallel>, #tpu.dimension_semantics<arbitrary>], iteration_bounds = array<i64: 1, 1>, scalar_prefetch = 0 : i64, scratch_operands = 3 : i64, tpu.core_type = #tpu.core_type<tc>, window_params = [{transform_indices = @transform_0, window_bounds = array<i64: 16, 32>}, {transform_indices = @transform_1, window_bounds = array<i64: 16, 32>}, {pipeline_mode = #tpu.pipeline_mode<synchronous>, transform_indices = @transform_2, window_bounds = array<i64: 32, 32>}, {pipeline_mode = #tpu.pipeline_mode<synchronous>, transform_indices = @transform_3, window_bounds = array<i64: 1, 32>}, {pipeline_mode = #tpu.pipeline_mode<synchronous>, transform_indices = @transform_4, window_bounds = array<i64: 1, 32>}, {pipeline_mode = #tpu.pipeline_mode<synchronous>, transform_indices = @transform_5, window_bounds = array<i64: 1, 32>}, {transform_indices = @transform_6, window_bounds = array<i64: 32, 64>}, {transform_indices = @transform_7, window_bounds = array<i64: 1, 64>}, {transform_indices = @transform_8, window_bounds = array<i64: 64, 32>}, {pipeline_mode = #tpu.pipeline_mode<synchronous>, transform_indices = @transform_9, window_bounds = array<i64: 1, 32>}, {transform_indices = @transform_10, window_bounds = array<i64: 16, 32>}]} {
    %c0_i32 = arith.constant 0 : i32
    %0 = arith.cmpi eq, %arg1, %c0_i32 : i32
    %1 = arith.extui %0 : i1 to i32
    %c0_i32_0 = arith.constant 0 : i32
    %2 = arith.cmpi ne, %1, %c0_i32_0 : i32
    scf.if %2 {
      %c0_31 = arith.constant 0 : index
      %c0_32 = arith.constant 0 : index
      %59 = vector.load %arg3[%c0_31, %c0_32] : memref<16x32xbf16, #tpu.memory_space<vmem>>, vector<16x32xbf16>
      %c0_33 = arith.constant 0 : index
      %c0_34 = arith.constant 0 : index
      %60 = vector.load %arg4[%c0_33, %c0_34] : memref<32x32xbf16, #tpu.memory_space<vmem>>, vector<32x32xbf16>
      %cst_35 = arith.constant dense<0.000000e+00> : vector<16x32xf32>
      %61 = tpu.matmul %59, %60, %cst_35 {dimension_numbers = #tpu.dot_dimension_numbers<[1], [0], [0], [1], [0, 0, 1, 1], [], []>} : vector<16x32xbf16>, vector<32x32xbf16>, vector<16x32xf32> -> vector<16x32xf32>
      %c0_36 = arith.constant 0 : index
      %c0_37 = arith.constant 0 : index
      %62 = vector.load %arg5[%c0_36, %c0_37] : memref<1x32xf32, #tpu.memory_space<vmem>>, vector<1x32xf32>
      %63 = vector.broadcast %62 : vector<1x32xf32> to vector<16x32xf32>
      %64 = arith.addf %61, %63 : vector<16x32xf32>
      %c0_38 = arith.constant 0 : index
      %c0_39 = arith.constant 0 : index
      %65 = vector.load %arg2[%c0_38, %c0_39] : memref<16x32xf32, #tpu.memory_space<vmem>>, vector<16x32xf32>
      %66 = arith.addf %65, %64 : vector<16x32xf32>
      %c0_40 = arith.constant 0 : index
      %c0_41 = arith.constant 0 : index
      %67 = vector.load %arg13[%c0_40, %c0_41] : memref<16x32xf32, #tpu.memory_space<vmem>>, vector<16x32xf32>
      tpu.vector_store %arg13[%c0_40, %c0_41], %66 {strides = array<i32>} : memref<16x32xf32, #tpu.memory_space<vmem>>, vector<16x32xf32>,
      %c0_42 = arith.constant 0 : index
      %c0_43 = arith.constant 0 : index
      %68 = vector.load %arg6[%c0_42, %c0_43] : memref<1x32xf32, #tpu.memory_space<vmem>>, vector<1x32xf32>
      %c0_44 = arith.constant 0 : index
      %c0_45 = arith.constant 0 : index
      %69 = vector.load %arg7[%c0_44, %c0_45] : memref<1x32xf32, #tpu.memory_space<vmem>>, vector<1x32xf32>
      %cst_46 = arith.constant dense<0.000000e+00> : vector<16xf32>
      %70 = vector.multi_reduction <add>, %66, %cst_46 [1] : vector<16x32xf32> to vector<16xf32>
      %71 = vector.shape_cast %70 : vector<16xf32> to vector<16x1xf32>
      %cst_47 = arith.constant 3.200000e+01 : f32
      %72 = vector.broadcast %cst_47 : f32 to vector<16x1xf32>
      %73 = arith.divf %71, %72 : vector<16x1xf32>
      %74 = vector.broadcast %73 : vector<16x1xf32> to vector<16x32xf32>
      %75 = arith.subf %66, %74 : vector<16x32xf32>
      %76 = arith.mulf %75, %75 : vector<16x32xf32>
      %cst_48 = arith.constant dense<0.000000e+00> : vector<16xf32>
      %77 = vector.multi_reduction <add>, %76, %cst_48 [1] : vector<16x32xf32> to vector<16xf32>
      %78 = vector.shape_cast %77 : vector<16xf32> to vector<16x1xf32>
      %cst_49 = arith.constant 3.200000e+01 : f32
      %79 = vector.broadcast %cst_49 : f32 to vector<16x1xf32>
      %80 = arith.divf %78, %79 : vector<16x1xf32>
      %81 = vector.broadcast %73 : vector<16x1xf32> to vector<16x32xf32>
      %82 = arith.subf %66, %81 : vector<16x32xf32>
      %cst_50 = arith.constant 9.99999974E-6 : f32
      %83 = vector.broadcast %cst_50 : f32 to vector<16x1xf32>
      %84 = arith.addf %80, %83 : vector<16x1xf32>
      %85 = math.rsqrt %84 : vector<16x1xf32>
      %86 = vector.broadcast %85 : vector<16x1xf32> to vector<16x32xf32>
      %87 = arith.mulf %82, %86 : vector<16x32xf32>
      %88 = vector.broadcast %68 : vector<1x32xf32> to vector<16x32xf32>
      %89 = arith.mulf %87, %88 : vector<16x32xf32>
      %90 = vector.broadcast %69 : vector<1x32xf32> to vector<16x32xf32>
      %91 = arith.addf %89, %90 : vector<16x32xf32>
      %92 = arith.truncf %91 : vector<16x32xf32> to vector<16x32xbf16>
      %c0_51 = arith.constant 0 : index
      %c0_52 = arith.constant 0 : index
      %93 = vector.load %arg14[%c0_51, %c0_52] : memref<16x32xbf16, #tpu.memory_space<vmem>>, vector<16x32xbf16>
      tpu.vector_store %arg14[%c0_51, %c0_52], %92 {strides = array<i32>} : memref<16x32xbf16, #tpu.memory_space<vmem>>, vector<16x32xbf16>,
      %cst_53 = arith.constant 0.000000e+00 : f32
      %94 = vector.broadcast %cst_53 : f32 to vector<16x32xf32>
      %c0_54 = arith.constant 0 : index
      %c0_55 = arith.constant 0 : index
      %95 = vector.load %arg15[%c0_54, %c0_55] : memref<16x32xf32, #tpu.memory_space<vmem>>, vector<16x32xf32>
      tpu.vector_store %arg15[%c0_54, %c0_55], %94 {strides = array<i32>} : memref<16x32xf32, #tpu.memory_space<vmem>>, vector<16x32xf32>,
    } else {
    }
    %c0 = arith.constant 0 : index
    %c0_1 = arith.constant 0 : index
    %3 = vector.load %arg14[%c0, %c0_1] : memref<16x32xbf16, #tpu.memory_space<vmem>>, vector<16x32xbf16>
    %c0_2 = arith.constant 0 : index
    %c0_3 = arith.constant 0 : index
    %4 = vector.load %arg8[%c0_2, %c0_3] : memref<32x64xbf16, #tpu.memory_space<vmem>>, vector<32x64xbf16>
    %cst = arith.constant dense<0.000000e+00> : vector<16x64xf32>
    %5 = tpu.matmul %3, %4, %cst {dimension_numbers = #tpu.dot_dimension_numbers<[1], [0], [0], [1], [0, 0, 1, 1], [], []>} : vector<16x32xbf16>, vector<32x64xbf16>, vector<16x64xf32> -> vector<16x64xf32>
    %c0_4 = arith.constant 0 : index
    %c0_5 = arith.constant 0 : index
    %6 = vector.load %arg9[%c0_4, %c0_5] : memref<1x64xf32, #tpu.memory_space<vmem>>, vector<1x64xf32>
    %7 = vector.broadcast %6 : vector<1x64xf32> to vector<16x64xf32>
    %8 = arith.addf %5, %7 : vector<16x64xf32>
    %cst_6 = arith.constant 5.000000e-01 : f32
    %9 = vector.broadcast %cst_6 : f32 to vector<16x64xf32>
    %10 = arith.mulf %9, %8 : vector<16x64xf32>
    %cst_7 = arith.constant 0.707106769 : f32
    %11 = vector.broadcast %cst_7 : f32 to vector<16x64xf32>
    %12 = arith.mulf %8, %11 : vector<16x64xf32>
    %cst_8 = arith.constant 0.000000e+00 : f32
    %13 = vector.broadcast %cst_8 : f32 to vector<16x64xf32>
    %14 = arith.cmpf oge, %12, %13 : vector<16x64xf32>
    %cst_9 = arith.constant 1.000000e+00 : f32
    %cst_10 = arith.constant -1.000000e+00 : f32
    %15 = vector.broadcast %cst_9 : f32 to vector<16x64xf32>
    %16 = vector.broadcast %cst_10 : f32 to vector<16x64xf32>
    %17 = arith.select %14, %15, %16 : vector<16x64xi1>, vector<16x64xf32>
    %18 = math.absf %12 : vector<16x64xf32>
    %cst_11 = arith.constant 0.327591091 : f32
    %19 = vector.broadcast %cst_11 : f32 to vector<16x64xf32>
    %20 = arith.mulf %19, %18 : vector<16x64xf32>
    %cst_12 = arith.constant 1.000000e+00 : f32
    %21 = vector.broadcast %cst_12 : f32 to vector<16x64xf32>
    %22 = arith.addf %21, %20 : vector<16x64xf32>
    %cst_13 = arith.constant 1.000000e+00 : f32
    %23 = vector.broadcast %cst_13 : f32 to vector<16x64xf32>
    %24 = arith.divf %23, %22 : vector<16x64xf32>
    %cst_14 = arith.constant 1.06140542 : f32
    %25 = vector.broadcast %cst_14 : f32 to vector<16x64xf32>
    %26 = arith.mulf %25, %24 : vector<16x64xf32>
    %cst_15 = arith.constant -1.45315206 : f32
    %27 = vector.broadcast %cst_15 : f32 to vector<16x64xf32>
    %28 = arith.addf %26, %27 : vector<16x64xf32>
    %29 = arith.mulf %28, %24 : vector<16x64xf32>
    %cst_16 = arith.constant 1.42141378 : f32
    %30 = vector.broadcast %cst_16 : f32 to vector<16x64xf32>
    %31 = arith.addf %29, %30 : vector<16x64xf32>
    %32 = arith.mulf %31, %24 : vector<16x64xf32>
    %cst_17 = arith.constant -0.284496725 : f32
    %33 = vector.broadcast %cst_17 : f32 to vector<16x64xf32>
    %34 = arith.addf %32, %33 : vector<16x64xf32>
    %35 = arith.mulf %34, %24 : vector<16x64xf32>
    %cst_18 = arith.constant 0.254829586 : f32
    %36 = vector.broadcast %cst_18 : f32 to vector<16x64xf32>
    %37 = arith.addf %35, %36 : vector<16x64xf32>
    %38 = arith.mulf %37, %24 : vector<16x64xf32>
    %cst_19 = arith.constant 0.000000e+00 : f32
    %39 = vector.broadcast %cst_19 : f32 to vector<16x64xf32>
    %40 = arith.subf %39, %18 : vector<16x64xf32>
    %41 = arith.mulf %40, %18 : vector<16x64xf32>
    %42 = math.exp %41 : vector<16x64xf32>
    %43 = arith.mulf %38, %42 : vector<16x64xf32>
    %cst_20 = arith.constant 1.000000e+00 : f32
    %44 = vector.broadcast %cst_20 : f32 to vector<16x64xf32>
    %45 = arith.subf %44, %43 : vector<16x64xf32>
    %46 = arith.mulf %17, %45 : vector<16x64xf32>
    %cst_21 = arith.constant 1.000000e+00 : f32
    %47 = vector.broadcast %cst_21 : f32 to vector<16x64xf32>
    %48 = arith.addf %47, %46 : vector<16x64xf32>
    %49 = arith.mulf %10, %48 : vector<16x64xf32>
    %50 = arith.truncf %49 : vector<16x64xf32> to vector<16x64xbf16>
    %c0_22 = arith.constant 0 : index
    %c0_23 = arith.constant 0 : index
    %51 = vector.load %arg15[%c0_22, %c0_23] : memref<16x32xf32, #tpu.memory_space<vmem>>, vector<16x32xf32>
    %c0_24 = arith.constant 0 : index
    %c0_25 = arith.constant 0 : index
    %52 = vector.load %arg10[%c0_24, %c0_25] : memref<64x32xbf16, #tpu.memory_space<vmem>>, vector<64x32xbf16>
    %cst_26 = arith.constant dense<0.000000e+00> : vector<16x32xf32>
    %53 = tpu.matmul %50, %52, %cst_26 {dimension_numbers = #tpu.dot_dimension_numbers<[1], [0], [0], [1], [0, 0, 1, 1], [], []>} : vector<16x64xbf16>, vector<64x32xbf16>, vector<16x32xf32> -> vector<16x32xf32>
    %54 = arith.addf %51, %53 : vector<16x32xf32>
    %c0_27 = arith.constant 0 : index
    %c0_28 = arith.constant 0 : index
    %55 = vector.load %arg15[%c0_27, %c0_28] : memref<16x32xf32, #tpu.memory_space<vmem>>, vector<16x32xf32>
    tpu.vector_store %arg15[%c0_27, %c0_28], %54 {strides = array<i32>} : memref<16x32xf32, #tpu.memory_space<vmem>>, vector<16x32xf32>,
    %c0_i32_29 = arith.constant 0 : i32
    %56 = arith.cmpi eq, %arg1, %c0_i32_29 : i32
    %57 = arith.extui %56 : i1 to i32
    %c0_i32_30 = arith.constant 0 : i32
    %58 = arith.cmpi ne, %57, %c0_i32_30 : i32
    scf.if %58 {
      %c0_31 = arith.constant 0 : index
      %c0_32 = arith.constant 0 : index
      %59 = vector.load %arg13[%c0_31, %c0_32] : memref<16x32xf32, #tpu.memory_space<vmem>>, vector<16x32xf32>
      %c0_33 = arith.constant 0 : index
      %c0_34 = arith.constant 0 : index
      %60 = vector.load %arg15[%c0_33, %c0_34] : memref<16x32xf32, #tpu.memory_space<vmem>>, vector<16x32xf32>
      %61 = arith.addf %59, %60 : vector<16x32xf32>
      %c0_35 = arith.constant 0 : index
      %c0_36 = arith.constant 0 : index
      %62 = vector.load %arg11[%c0_35, %c0_36] : memref<1x32xf32, #tpu.memory_space<vmem>>, vector<1x32xf32>
      %63 = vector.broadcast %62 : vector<1x32xf32> to vector<16x32xf32>
      %64 = arith.addf %61, %63 : vector<16x32xf32>
      %c0_37 = arith.constant 0 : index
      %c0_38 = arith.constant 0 : index
      %65 = vector.load %arg12[%c0_37, %c0_38] : memref<16x32xf32, #tpu.memory_space<vmem>>, vector<16x32xf32>
      tpu.vector_store %arg12[%c0_37, %c0_38], %64 {strides = array<i32>} : memref<16x32xf32, #tpu.memory_space<vmem>>, vector<16x32xf32>,
    } else {
    }
    return
  }
  func.func @transform_0(%arg0: i32, %arg1: i32) -> (i32, i32) {
    %c0_i32 = arith.constant 0 : i32
    %c0_i32_0 = arith.constant 0 : i32
    return %arg0, %c0_i32 : i32, i32
  }
  func.func @transform_1(%arg0: i32, %arg1: i32) -> (i32, i32) {
    %c0_i32 = arith.constant 0 : i32
    %c0_i32_0 = arith.constant 0 : i32
    return %arg0, %c0_i32 : i32, i32
  }
  func.func @transform_2(%arg0: i32, %arg1: i32) -> (i32, i32) {
    %c0_i32 = arith.constant 0 : i32
    %c0_i32_0 = arith.constant 0 : i32
    %c0_i32_1 = arith.constant 0 : i32
    return %c0_i32, %c0_i32_0 : i32, i32
  }
  func.func @transform_3(%arg0: i32, %arg1: i32) -> (i32, i32) {
    %c0_i32 = arith.constant 0 : i32
    %c0_i32_0 = arith.constant 0 : i32
    %c0_i32_1 = arith.constant 0 : i32
    return %c0_i32, %c0_i32_0 : i32, i32
  }
  func.func @transform_4(%arg0: i32, %arg1: i32) -> (i32, i32) {
    %c0_i32 = arith.constant 0 : i32
    %c0_i32_0 = arith.constant 0 : i32
    %c0_i32_1 = arith.constant 0 : i32
    return %c0_i32, %c0_i32_0 : i32, i32
  }
  func.func @transform_5(%arg0: i32, %arg1: i32) -> (i32, i32) {
    %c0_i32 = arith.constant 0 : i32
    %c0_i32_0 = arith.constant 0 : i32
    %c0_i32_1 = arith.constant 0 : i32
    return %c0_i32, %c0_i32_0 : i32, i32
  }
  func.func @transform_6(%arg0: i32, %arg1: i32) -> (i32, i32) {
    %c0_i32 = arith.constant 0 : i32
    %c0_i32_0 = arith.constant 0 : i32
    return %c0_i32, %arg1 : i32, i32
  }
  func.func @transform_7(%arg0: i32, %arg1: i32) -> (i32, i32) {
    %c0_i32 = arith.constant 0 : i32
    %c0_i32_0 = arith.constant 0 : i32
    return %c0_i32, %arg1 : i32, i32
  }
  func.func @transform_8(%arg0: i32, %arg1: i32) -> (i32, i32) {
    %c0_i32 = arith.constant 0 : i32
    %c0_i32_0 = arith.constant 0 : i32
    return %arg1, %c0_i32 : i32, i32
  }
  func.func @transform_9(%arg0: i32, %arg1: i32) -> (i32, i32) {
    %c0_i32 = arith.constant 0 : i32
    %c0_i32_0 = arith.constant 0 : i32
    %c0_i32_1 = arith.constant 0 : i32
    return %c0_i32, %c0_i32_0 : i32, i32
  }
  func.func @transform_10(%arg0: i32, %arg1: i32) -> (i32, i32) {
    %c0_i32 = arith.constant 0 : i32
    %c0_i32_0 = arith.constant 0 : i32
    return %arg0, %c0_i32 : i32, i32
  }
}

module attributes {stable_mosaic.version = 11 : i64} {
  func.func @_matmul_kernel(%arg0: i32, %arg1: i32, %arg2: i32, %arg3: memref<8x32xf32, #tpu.memory_space<vmem>>, %arg4: memref<32x256xbf16, #tpu.memory_space<vmem>>, %arg5: memref<8x256xf32, #tpu.memory_space<vmem>>, %arg6: memref<8x256xf32, #tpu.memory_space<vmem>>) attributes {dimension_semantics = [#tpu.dimension_semantics<parallel>, #tpu.dimension_semantics<parallel>, #tpu.dimension_semantics<arbitrary>], iteration_bounds = array<i64: 1, 1, 1>, scalar_prefetch = 0 : i64, scratch_operands = 1 : i64, tpu.core_type = #tpu.core_type<tc>, window_params = [{transform_indices = @transform_0, window_bounds = array<i64: 8, 32>}, {transform_indices = @transform_1, window_bounds = array<i64: 32, 256>}, {transform_indices = @transform_2, window_bounds = array<i64: 8, 256>}]} {
    %c0_i32 = arith.constant 0 : i32
    %0 = arith.cmpi eq, %arg2, %c0_i32 : i32
    %1 = arith.extui %0 : i1 to i32
    %c0_i32_0 = arith.constant 0 : i32
    %2 = arith.cmpi ne, %1, %c0_i32_0 : i32
    scf.if %2 {
      %cst_10 = arith.constant 0.000000e+00 : f32
      %13 = vector.broadcast %cst_10 : f32 to vector<8x256xf32>
      %c0_11 = arith.constant 0 : index
      %c0_12 = arith.constant 0 : index
      %14 = vector.load %arg6[%c0_11, %c0_12] : memref<8x256xf32, #tpu.memory_space<vmem>>, vector<8x256xf32>
      tpu.vector_store %arg6[%c0_11, %c0_12], %13 {strides = array<i32>} : memref<8x256xf32, #tpu.memory_space<vmem>>, vector<8x256xf32>,
    } else {
    }
    %c0 = arith.constant 0 : index
    %c0_1 = arith.constant 0 : index
    %3 = vector.load %arg6[%c0, %c0_1] : memref<8x256xf32, #tpu.memory_space<vmem>>, vector<8x256xf32>
    %c0_2 = arith.constant 0 : index
    %c0_3 = arith.constant 0 : index
    %4 = vector.load %arg3[%c0_2, %c0_3] : memref<8x32xf32, #tpu.memory_space<vmem>>, vector<8x32xf32>
    %5 = arith.truncf %4 : vector<8x32xf32> to vector<8x32xbf16>
    %c0_4 = arith.constant 0 : index
    %c0_5 = arith.constant 0 : index
    %6 = vector.load %arg4[%c0_4, %c0_5] : memref<32x256xbf16, #tpu.memory_space<vmem>>, vector<32x256xbf16>
    %cst = arith.constant dense<0.000000e+00> : vector<8x256xf32>
    %7 = tpu.matmul %5, %6, %cst {dimension_numbers = #tpu.dot_dimension_numbers<[1], [0], [0], [1], [0, 0, 1, 1], [], []>} : vector<8x32xbf16>, vector<32x256xbf16>, vector<8x256xf32> -> vector<8x256xf32>
    %8 = arith.addf %3, %7 : vector<8x256xf32>
    %c0_6 = arith.constant 0 : index
    %c0_7 = arith.constant 0 : index
    %9 = vector.load %arg6[%c0_6, %c0_7] : memref<8x256xf32, #tpu.memory_space<vmem>>, vector<8x256xf32>
    tpu.vector_store %arg6[%c0_6, %c0_7], %8 {strides = array<i32>} : memref<8x256xf32, #tpu.memory_space<vmem>>, vector<8x256xf32>,
    %c0_i32_8 = arith.constant 0 : i32
    %10 = arith.cmpi eq, %arg2, %c0_i32_8 : i32
    %11 = arith.extui %10 : i1 to i32
    %c0_i32_9 = arith.constant 0 : i32
    %12 = arith.cmpi ne, %11, %c0_i32_9 : i32
    scf.if %12 {
      %c0_10 = arith.constant 0 : index
      %c0_11 = arith.constant 0 : index
      %13 = vector.load %arg6[%c0_10, %c0_11] : memref<8x256xf32, #tpu.memory_space<vmem>>, vector<8x256xf32>
      %c0_12 = arith.constant 0 : index
      %c0_13 = arith.constant 0 : index
      %14 = vector.load %arg5[%c0_12, %c0_13] : memref<8x256xf32, #tpu.memory_space<vmem>>, vector<8x256xf32>
      tpu.vector_store %arg5[%c0_12, %c0_13], %13 {strides = array<i32>} : memref<8x256xf32, #tpu.memory_space<vmem>>, vector<8x256xf32>,
    } else {
    }
    return
  }
  func.func @transform_0(%arg0: i32, %arg1: i32, %arg2: i32) -> (i32, i32) {
    %c0_i32 = arith.constant 0 : i32
    return %arg0, %arg2 : i32, i32
  }
  func.func @transform_1(%arg0: i32, %arg1: i32, %arg2: i32) -> (i32, i32) {
    %c0_i32 = arith.constant 0 : i32
    return %arg2, %arg1 : i32, i32
  }
  func.func @transform_2(%arg0: i32, %arg1: i32, %arg2: i32) -> (i32, i32) {
    %c0_i32 = arith.constant 0 : i32
    return %arg0, %arg1 : i32, i32
  }
}

</mosaic_0001>

<bundles_post_ra>
// kernel: gpt_forward.8
= control target key start
LH: loop header
LB: loop body
LE: loop exit
PB: predicated region body
PF: predicated region fallthrough
CT: control target
= control target key end

     0   :  { %s655_s12 = smov 0   ;;  %s657_s13 = smov 0   ;;  %s711_s0 = inlined_call_operand.vmem [shape: bf16[8,8,8], index: 0, kind: input, shape index: {}]   ;;  %s712_s1 = inlined_call_operand.vmem [shape: bf16[8,8,8], index: 1, kind: input, shape index: {}]   ;;  %s713_s2 = inlined_call_operand.vmem [shape: bf16[8,8,8], index: 2, kind: input, shape index: {}]   ;;  %s714_s3 = inlined_call_operand.vmem [shape: bf16[8,8,8], index: 3, kind: output, shape index: {}]  }
   0x1   :  { %s659_s14 = smov 0  }
   0x2 LB: > { %s32_s15 = sadd.s32 1, %s625_s13  ;;  %p546_p0 = scmp.ge.s32.totalorder %s629_s14, 1  ;;  %s629_s14 = sphi %s659_s14, %s13_s14   ;;  %s625_s13 = sphi %s657_s13, %s716_s13   ;;  %s621_s12 = sphi %s655_s12, %s715_s12  }
   0x3   : > { %p34_p1 = scmp.ge.s32.totalorder %s32_s15, 8  ;;  %p190_p2 = scmp.lt.s32.totalorder %s629_s14, 9 }
   0x5   : > { %s718_s15 = smov (%p34_p1, %s32_s15), 0  ;;  %p191_p3 = pnand %p546_p0, %p190_p2 }
   0x6   : > { %p232_p4 = scmp.lt.s32.totalorder (!%p191_p3), %s621_s12, 7  ;;  %vm268_vm0 = vcmask (!%p191_p3), 64512   ;;  %v631_v0 = vmov (!%p191_p3), 0.0   ;;  %vm632_vm1 = vmmov (!%p191_p3), 0   ;;  %vm265_vm2 = vcmask (!%p191_p3), 7168  }
   0x7   : > { %194 = sbr.rel (%p191_p3) target bundleno = 824 (0x338), region = 32  ;;  %559 = vmatprep.subr.bf16.mxu0 (!%p191_p3), %v631_v0  ;;  %269 = vst.msk [vmem:[#allocation4] sm:$0xff] (!%p191_p3), %vm268_vm0, %v631_v0  ;;  %561 = vmatprep.mubr.msk.bf16.mxu0 (!%p191_p3), %vm632_vm1, %v631_v0  ;;  %v633_v4 = vmov (!%p191_p3), -1e+30   ;;  %v327_v5 = vlaneseq (!%p191_p3)  ;;  %v634_v14 = vmov (!%p191_p3), 0   ;;  %vm373_vm4 = vcmask (!%p191_p3), 1043456  }
   0x8   : > { %565 = vmatprep.subr.bf16.mxu1 (!%p191_p3), %v631_v0  ;;  %567 = vmatprep.mubr.msk.bf16.mxu1 (!%p191_p3), %vm632_vm1, %v631_v0  ;;  %266 = vst.msk [vmem:[#allocation2] sm:$0xff] (!%p191_p3), %vm265_vm2, %v633_v4  ;;  %267 = vst.msk [vmem:[#allocation3] sm:$0xff] (!%p191_p3), %vm265_vm2, %v631_v0  ;;  %vm433_vm5 = vcmask (!%p191_p3), 60416  }
   0x9   : > { %v328_v6 = vshrl.u32 (!%p191_p3), %v327_v5, 7  ;;  %v332_v7 = vand.u32 (!%p191_p3), 127, %v327_v5  ;;  %599 = vset.pattern.permute.xlu0 (!%p191_p3), %v634_v14  ;;  %600 = vset.pattern.permute.xlu1 (!%p191_p3), %v634_v14 }
   0xb   : > { %vm335_vm3 = vcmp.ge.s32.totalorder (!%p191_p3), %v328_v6, %v332_v7 }
   0xe   : > { %s720_s12 = smov (!%p232_p4, %s621_s12), 7  ;;  %v361_v35 = vld [vmem:[#allocation4] sm:$0xff] }
   0xf   : > { %s674_s16 = sshll.u32 %s720_s12, 2  ;;  %v337_v15 = vld [vmem:[#allocation2] sm:$0xff]  ;;  %v353_v29 = vld [vmem:[#allocation3] sm:$0xff] }
  0x10   : > { %s245_s19 = scalar_lea.vmem %s712_s1, %s674_s16  ;;  %s238_s22 = scalar_lea.vmem %s711_s0, %s674_s16 }
  0x11   : > { %v278_v1 = vld [vmem:[%s245_s19] sm:$0xf]  ;;  %s252_s25 = scalar_lea.vmem %s713_s2, %s674_s16  ;;  %s259_s28 = scalar_lea.vmem %s714_s3, %s674_s16 }
  0x12   : > { %v284_v2 = vsel %vm268_vm0, %v278_v1, 0  ;;  %v277_v3 = vld [vmem:[%s238_s22] sm:$0xf] }
  0x13   : > { %560 = vmatpush3.bf16.xpose.msra.mxu0 %v284_v2  ;;  %v369_v19 = vld [vmem:[%s252_s25] sm:$0xf] }
  0x14   : > { %v375_v20 = vsel %vm373_vm4, %v369_v19, 0 }
  0x15   : > { %566 = vmatpush3.bf16.msra.mxu1 %v375_v20 }
  0x1a   : > { %562 = vmatmul.mubr.msk.bf16.vlgmr.msra.gmra.mrb[0].mxu0 %vm268_vm0, %v277_v3 }
  0xed   : > { %v320_v8 = vpop.f32.mrb[0].mxu0 }
  0xee   : > { %v336_v9 = vsel %vm335_vm3, %v320_v8, -1e+30  ;;  %v563_v10 = vpop.f32.mrb[1].mxu0 }
  0xef   : > { %v323_v11 = vpop.f32.mrb[2].mxu0  ;;  %v338_v12 = vsel %vm268_vm0, %v336_v9, -inf }
  0xf0   : > { %339 = vmax.xlane.f32.xlu0 %v338_v12  ;;  %v564_v13 = vpop.f32.mrb[3].mxu0 }
 0x17d   : > { %v340_v16 = vpop.xlane.xlu0 %339 }
 0x17e   : > { %v341_v17 = vmax.f32 %v337_v15, %v340_v16 }
 0x180   : > { %v342_v18 = vsub.f32 %v337_v15, %v341_v17  ;;  %419 = vst.msk [vmem:[#allocation2] sm:$0xff] %vm265_vm2, %v341_v17  ;;  %347 = vperm.xlu0 %599, %v341_v17  }
 0x182   : > { %v343_v27 = vmul.f32 1.442695, %v342_v18 }
 0x1ff   : > { %v348_v21 = vpop.permute.xlu0 %347 }
 0x200   : > { %v350_v22 = vsub.f32 %v336_v9, %v348_v21 }
 0x202   : > { %v351_v23 = vmul.f32 1.442695, %v350_v22 }
 0x204   : > { %601 = vpow2.f32 %v351_v23 }
 0x205   : > { %603 = vpow2.f32 %v343_v27 }
 0x20e   : > { %v602_v24 = vpop.eup %601 }
 0x20f   : > { %v355_v25 = vsel %vm268_vm0, %v602_v24, 0.0  ;;  %v368_v26 = vpack.c.bf16 %v602_v24, %v602_v24  ;;  %v604_v28 = vpop.eup %603 }
 0x210   : > { %356 = vadd.xlane.f32.xlu1 %v355_v25  ;;  %v354_v30 = vmul.f32 %v604_v28, %v353_v29 }
 0x211   : > { %568 = vmatmul.mubr.msk.bf16.vlgmr.msra.gmra.mrb[0].mxu1 %vm268_vm0, %v368_v26 }
 0x221   : > { %364 = vperm.xlu1 %600, %v604_v28  }
 0x29d   : > { %v357_v31 = vpop.xlane.xlu1 %356 }
 0x29e   : > { %v358_v32 = vadd.f32 %v357_v31, %v354_v30 }
 0x2a0   : > { %360 = vst.msk [vmem:[#allocation3] sm:$0xff] %vm265_vm2, %v358_v32 }
 0x2a1   : > { %v365_v36 = vpop.permute.xlu1 %364 }
 0x2a2   : > { %v367_v37 = vmul.f32 %v365_v36, %v361_v35 }
 0x2a7   : > { %v423_v33 = vld [vmem:[#allocation3] sm:$0xff] }
 0x2a8   : > { %605 = vrcp.f32 %v423_v33 }
 0x2b2   : > { %v606_v34 = vpop.eup %605 }
 0x2b3   : > { %428 = vperm.xlu1 %600, %v606_v34  }
 0x2e4   : > { %v411_v38 = vpop.f32.mrb[0].mxu1 }
 0x2e5   : > { %v417_v39 = vadd.f32 %v411_v38, %v367_v37  ;;  %v569_v40 = vpop.f32.mrb[1].mxu1 }
 0x2e6   : > { %v414_v41 = vpop.f32.mrb[2].mxu1 }
 0x2e7   : > { %418 = vst.msk [vmem:[#allocation4] sm:$0xff] %vm268_vm0, %v417_v39  ;;  %v570_v42 = vpop.f32.mrb[3].mxu1 }
 0x2ee   : > { %v425_v43 = vld [vmem:[#allocation4] sm:$0xff] }
 0x332   : > { %v429_v44 = vpop.permute.xlu1 %428 }
 0x333   : > { %v431_v45 = vmul.f32 %v429_v44, %v425_v43 }
 0x335   : > { %v432_v46 = vpack.c.bf16 %v431_v45, %v431_v45 }
 0x337   : > { %434 = vst.msk [vmem:[%s259_s28] sm:$0xf] %vm433_vm5, %v432_v46 }
 0x338 PF: > { %s13_s14 = sadd.s32 1, %s629_s14   ;;  %s715_s12 = smov %s625_s13 }
 0x339   : > { %p10_p5 = scmp.ge.s32.totalorder %s13_s14, 10   ;;  %s716_s13 = smov %s718_s15 }
 0x33b   :  { %12 = sbr.rel (!%p10_p5) target bundleno = 2 (0x2), region = 80 }

// kernel: gpt_forward.7
= control target key start
LH: loop header
LB: loop body
LE: loop exit
PB: predicated region body
PF: predicated region fallthrough
CT: control target
= control target key end

     0   :  { %vm28_vm0 = vcmask 261120   ;;  %v398_v15 = vmov 0.0   ;;  %vm399_vm1 = vmmov 0   ;;  %vm282_vm2 = vcmask 257024   ;;  %s513_s0 = inlined_call_operand.vmem [shape: f32[16,32], index: 0, kind: input, shape index: {}]   ;;  %s514_s3 = inlined_call_operand.vmem [shape: bf16[3,32,32], index: 3, kind: input, shape index: {}]   ;;  %s515_s1 = inlined_call_operand.vmem [shape: f32[1,32], index: 1, kind: input, shape index: {}]   ;;  %s516_s2 = inlined_call_operand.vmem [shape: f32[1,32], index: 2, kind: input, shape index: {}]   ;;  %s517_s4 = inlined_call_operand.vmem [shape: f32[3,1,32], index: 4, kind: input, shape index: {}]   ;;  %s518_s6 = inlined_call_operand.vmem [shape: bf16[16,32], index: 6, kind: output, shape index: {1}]   ;;  %s519_s5 = inlined_call_operand.vmem [shape: bf16[16,32], index: 5, kind: output, shape index: {0}]   ;;  %s520_s7 = inlined_call_operand.vmem [shape: bf16[16,32], index: 7, kind: output, shape index: {2}]  }
   0x1   :  { %v24_v0 = vld [vmem:[%s513_s0] sm:$0xff]  ;;  %v25_v1 = vld [vmem:[%s513_s0 + $0x8] sm:$0xff]  ;;  %362 = vmatprep.subr.bf16.mxu0 %v398_v15  ;;  %370 = vmatprep.subr.bf16.mxu1 %v398_v15  ;;  %v389_v16 = vld [vmem:[%s514_s3 + $0x10] sm:$0xff]  }
   0x2   :  { %v29_v2 = vsel %vm28_vm0, %v24_v0, 0.0  ;;  %v32_v3 = vsel %vm28_vm0, %v25_v1, 0.0  ;;  %v388_v14 = vld [vmem:[%s514_s3] sm:$0xff]   ;;  %v390_v17 = vld [vmem:[%s514_s3 + $0x8] sm:$0xff]   ;;  %366 = vmatprep.mubr.msk.bf16.mxu0 %vm399_vm1, %v398_v15  ;;  %371 = vmatpush3.bf16.msra.mxu1 %v389_v16  ;;  %v391_v18 = vld [vmem:[%s514_s3 + $0x18] sm:$0xff]  }
   0x3   :  { %30 = vadd.xlane.f32.xlu0 %v29_v2  ;;  %363 = vmatpush3.bf16.msra.mxu0 %v388_v14  ;;  %v317_v27 = vld [vmem:[%s515_s1] ss:$0 sm:$0xff]  ;;  %v393_v37 = vld [vmem:[%s514_s3 + $0x28] sm:$0xff]   ;;  %v328_v39 = vld [vmem:[%s517_s4 + $0x1] ss:$0 sm:$0xff] }
   0x4   :  { %364 = vmatprep.subr.bf16.mxu0 %v398_v15  ;;  %372 = vmatprep.subr.bf16.mxu1 %v398_v15  ;;  %v318_v31 = vld [vmem:[%s516_s2] ss:$0 sm:$0xff]  ;;  %v337_v57 = vld [vmem:[%s517_s4 + $0x2] ss:$0 sm:$0xff] }
   0x5   :  { %374 = vmatprep.mubr.msk.bf16.mxu1 %vm399_vm1, %v398_v15  ;;  %v392_v35 = vld [vmem:[%s514_s3 + $0x20] sm:$0xff]  }
   0x6   :  { %373 = vmatpush3.bf16.msra.mxu1 %v391_v18  ;;  %v319_v38 = vld [vmem:[%s517_s4] ss:$0 sm:$0xff] }
   0x7   :  { %33 = vadd.xlane.f32.xlu0 %v32_v3  ;;  %365 = vmatpush3.bf16.msra.mxu0 %v390_v17 }
   0x8   :  { %378 = vmatprep.subr.bf16.mxu0 %v398_v15 }
  0x90   :  { %v31_v4 = vpop.xlane.xlu0 %30 }
  0x91   :  { %v36_v5 = vmul.f32 0.03125, %v31_v4 }
  0x93   :  { %v38_v6 = vsub.f32 %v24_v0, %v36_v5 }
  0x94   :  { %v34_v7 = vpop.xlane.xlu0 %33 }
  0x95   :  { %v37_v8 = vmul.f32 0.03125, %v34_v7  ;;  %v40_v9 = vmul.f32 %v38_v6, %v38_v6 }
  0x97   :  { %v39_v10 = vsub.f32 %v25_v1, %v37_v8  ;;  %v42_v11 = vsel %vm28_vm0, %v40_v9, 0.0 }
  0x98   :  { %43 = vadd.xlane.f32.xlu1 %v42_v11 }
  0x99   :  { %v41_v12 = vmul.f32 %v39_v10, %v39_v10 }
  0x9b   :  { %v45_v13 = vsel %vm28_vm0, %v41_v12, 0.0 }
  0x9c   :  { %46 = vadd.xlane.f32.xlu1 %v45_v13 }
 0x125   :  { %v44_v19 = vpop.xlane.xlu1 %43 }
 0x126   :  { %v48_v20 = vmul.f32 0.03125, %v44_v19 }
 0x128   :  { %v50_v21 = vadd.f32 1e-05, %v48_v20 }
 0x129   :  { %v47_v22 = vpop.xlane.xlu1 %46 }
 0x12a   :  { %394 = vrsqrt.f32 %v50_v21  ;;  %v49_v23 = vmul.f32 0.03125, %v47_v22 }
 0x12c   :  { %v51_v24 = vadd.f32 1e-05, %v49_v23 }
 0x12e   :  { %396 = vrsqrt.f32 %v51_v24 }
 0x134   :  { %v395_v25 = vpop.eup %394 }
 0x135   :  { %v54_v26 = vmul.f32 %v395_v25, %v38_v6 }
 0x137   :  { %v62_v30 = vmul.f32 %v317_v27, %v54_v26 }
 0x138   :  { %v397_v28 = vpop.eup %396 }
 0x139   :  { %v55_v29 = vmul.f32 %v397_v28, %v39_v10  ;;  %v70_v33 = vadd.f32 %v318_v31, %v62_v30 }
 0x13b   :  { %v63_v32 = vmul.f32 %v317_v27, %v55_v29 }
 0x13d   :  { %v71_v34 = vadd.f32 %v318_v31, %v63_v32 }
 0x13f   :  { %v72_v36 = vpack.c.bf16 %v71_v34, %v70_v33 }
 0x141   :  { %367 = vmatmul.mubr.msk.bf16.vlgmr.msra.gmra.mrb[0].mxu0 %vm28_vm0, %v72_v36  ;;  %375 = vmatmul.mubr.msk.bf16.vlgmr.msra.gmra.mrb[0].mxu1 %vm28_vm0, %v72_v36 }
 0x142   :  { %379 = vmatpush3.bf16.msra.mxu0 %v392_v35  ;;  %382 = vmatprep.mubr.msk.bf16.mxu0 %vm399_vm1, %v398_v15 }
 0x143   :  { %380 = vmatprep.subr.bf16.mxu0 %v398_v15 }
 0x146   :  { %381 = vmatpush3.bf16.msra.mxu0 %v393_v37 }
 0x149   :  { %383 = vmatmul.mubr.msk.bf16.vlgmr.msra.gmra.mrb[4].mxu0 %vm28_vm0, %v72_v36 }
 0x214   :  { %v133_v40 = vpop.f32.mrb[0].mxu0  ;;  %v199_v41 = vpop.f32.mrb[0].mxu1 }
 0x215   :  { %v134_v42 = vadd.f32 %v319_v38, %v133_v40  ;;  %v200_v43 = vadd.f32 %v328_v39, %v199_v41  ;;  %v368_v44 = vpop.f32.mrb[1].mxu0  ;;  %v376_v45 = vpop.f32.mrb[1].mxu1 }
 0x216   :  { %v136_v46 = vpop.f32.mrb[2].mxu0  ;;  %v202_v47 = vpop.f32.mrb[2].mxu1 }
 0x217   :  { %v272_v48 = vmul.f32 0.35355338, %v134_v42  ;;  %v349_v49 = vpack.c.bf16 %v200_v43, %v200_v43  ;;  %v137_v50 = vadd.f32 %v319_v38, %v136_v46  ;;  %v203_v51 = vadd.f32 %v328_v39, %v202_v47  ;;  %v369_v52 = vpop.f32.mrb[3].mxu0  ;;  %v377_v53 = vpop.f32.mrb[3].mxu1 }
 0x219   :  { %v347_v54 = vpack.c.bf16 %v272_v48, %v272_v48  ;;  %293 = vst.msk [vmem:[%s518_s6] sm:$0xf] %vm282_vm2, %v349_v49  ;;  %v273_v55 = vmul.f32 0.35355338, %v137_v50  ;;  %v350_v56 = vpack.c.bf16 %v203_v51, %v203_v51 }
 0x21b   :  { %283 = vst.msk [vmem:[%s519_s5] sm:$0xf] %vm282_vm2, %v347_v54  ;;  %v348_v58 = vpack.c.bf16 %v273_v55, %v273_v55  ;;  %294 = vst.msk [vmem:[%s518_s6 + $0x4] sm:$0xf] %vm282_vm2, %v350_v56 }
 0x21c   :  { %v265_v59 = vpop.f32.mrb[4].mxu0 }
 0x21d   :  { %284 = vst.msk [vmem:[%s519_s5 + $0x4] sm:$0xf] %vm282_vm2, %v348_v58  ;;  %v266_v60 = vadd.f32 %v337_v57, %v265_v59  ;;  %v384_v61 = vpop.f32.mrb[5].mxu0 }
 0x21e   :  { %v268_v62 = vpop.f32.mrb[6].mxu0 }
 0x21f   :  { %v351_v63 = vpack.c.bf16 %v266_v60, %v266_v60  ;;  %v269_v0 = vadd.f32 %v337_v57, %v268_v62  ;;  %v385_v1 = vpop.f32.mrb[7].mxu0 }
 0x221   :  { %303 = vst.msk [vmem:[%s520_s7] sm:$0xf] %vm282_vm2, %v351_v63  ;;  %v352_v2 = vpack.c.bf16 %v269_v0, %v269_v0 }
 0x223   :  { %304 = vst.msk [vmem:[%s520_s7 + $0x4] sm:$0xf] %vm282_vm2, %v352_v2 }

// kernel: gpt_forward.9
= control target key start
LH: loop header
LB: loop body
LE: loop exit
PB: predicated region body
PF: predicated region fallthrough
CT: control target
= control target key end

     0   :  { %vm70_vm0 = vcmask 261120   ;;  %v481_v0 = vmov 0.0   ;;  %vm482_vm1 = vmmov 0   ;;  %vm328_vm4 = vcmask 523264   ;;  %s621_s2 = inlined_call_operand.vmem [shape: bf16[32,32], index: 2, kind: input, shape index: {}]   ;;  %s622_s1 = inlined_call_operand.vmem [shape: bf16[16,32], index: 1, kind: input, shape index: {}]   ;;  %s623_s3 = inlined_call_operand.vmem [shape: f32[1,32], index: 3, kind: input, shape index: {}]   ;;  %s624_s0 = inlined_call_operand.vmem [shape: f32[16,32], index: 0, kind: input, shape index: {}, may-alias: {0,10}]   ;;  %s625_s6 = inlined_call_operand.vmem [shape: bf16[32,64], index: 6, kind: input, shape index: {}]   ;;  %s626_s4 = inlined_call_operand.vmem [shape: f32[1,32], index: 4, kind: input, shape index: {}]   ;;  %s627_s5 = inlined_call_operand.vmem [shape: f32[1,32], index: 5, kind: input, shape index: {}]   ;;  %s628_s8 = inlined_call_operand.vmem [shape: bf16[64,32], index: 8, kind: input, shape index: {}]   ;;  %s629_s7 = inlined_call_operand.vmem [shape: f32[1,64], index: 7, kind: input, shape index: {}]   ;;  %s630_s9 = inlined_call_operand.vmem [shape: f32[1,32], index: 9, kind: input, shape index: {}]   ;;  %s631_s10 = inlined_call_operand.vmem [shape: f32[16,32], index: 10, kind: output, shape index: {}, may-alias: {0,10}]  }
   0x1   :  { %429 = vmatprep.subr.bf16.mxu1 %v481_v0  ;;  %v460_v1 = vld [vmem:[%s621_s2] sm:$0xff]   ;;  %433 = vmatprep.mubr.msk.bf16.mxu1 %vm482_vm1, %v481_v0  ;;  %168 = vst.msk [vmem:[#allocation4] sm:$0xff] %vm70_vm0, %v481_v0  ;;  %169 = vst.msk [vmem:[#allocation4 + $0x8] sm:$0xff] %vm70_vm0, %v481_v0  ;;  %v461_v2 = vld [vmem:[%s621_s2 + $0x8] sm:$0xff]  }
   0x2   :  { %445 = vmatprep.subr.bf16.mxu0 %v481_v0  ;;  %453 = vmatprep.mubr.msk.bf16.mxu0 %vm482_vm1, %v481_v0  ;;  %v462_v3 = vld [vmem:[%s622_s1] sm:$0xff]   ;;  %v116_v10 = vld [vmem:[%s624_s0 + $0x8] sm:$0xff]  ;;  %v467_v49 = vld [vmem:[%s628_s8 + $0x10] sm:$0xff]  }
   0x3   :  { %430 = vmatpush3.bf16.msra.mxu1 %v460_v1  ;;  %v401_v4 = vld [vmem:[%s623_s3] ss:$0 sm:$0xff]  ;;  %v464_v28 = vld [vmem:[%s625_s6 + $0x8] sm:$0xff]   ;;  %v468_v50 = vld [vmem:[%s628_s8 + $0x18] sm:$0xff]  }
   0x4   :  { %431 = vmatprep.subr.bf16.mxu1 %v481_v0  ;;  %v115_v6 = vld [vmem:[%s624_s0] sm:$0xff]  ;;  %v466_v48 = vld [vmem:[%s628_s8 + $0x8] sm:$0xff]  }
   0x5   :  { %v463_v27 = vld [vmem:[%s625_s6] sm:$0xff]  }
   0x6   :  { %v406_v37 = vld [vmem:[%s626_s4] ss:$0 sm:$0xff] }
   0x7   :  { %432 = vmatpush3.bf16.msra.mxu1 %v461_v2  ;;  %v407_v41 = vld [vmem:[%s627_s5] ss:$0 sm:$0xff] }
   0x8   :  { %437 = vmatprep.subr.bf16.mxu1 %v481_v0  ;;  %v465_v47 = vld [vmem:[%s628_s8] sm:$0xff]  }
   0x9   :  { %446 = vmatpush3.bf16.msra.mxu0 %v465_v47  ;;  %v408_v51 = vld [vmem:[%s629_s7] ss:$0 sm:$0xff] }
   0xa   :  { %434 = vmatmul.mubr.msk.bf16.vlgmr.msra.gmra.mrb[0].mxu1 %vm70_vm0, %v462_v3  ;;  %447 = vmatprep.subr.bf16.mxu0 %v481_v0 }
   0xb   :  { %441 = vmatprep.mubr.msk.bf16.mxu1 %vm482_vm1, %v481_v0  ;;  %438 = vmatpush3.bf16.msra.mxu1 %v463_v27 }
   0xc   :  { %439 = vmatprep.subr.bf16.mxu1 %v481_v0 }
   0xd   :  { %448 = vmatpush3.bf16.msra.mxu0 %v466_v48  ;;  %v295_v48 = vld [vmem:[#allocation4 + $0x8] sm:$0xff] }
   0xe   :  { %449 = vmatprep.subr.bf16.mxu0 %v481_v0 }
   0xf   :  { %440 = vmatpush3.bf16.msra.mxu1 %v464_v28 }
  0x11   :  { %450 = vmatpush3.bf16.msra.mxu0 %v467_v49 }
  0x12   :  { %451 = vmatprep.subr.bf16.mxu0 %v481_v0 }
  0x15   :  { %452 = vmatpush3.bf16.msra.mxu0 %v468_v50 }
  0xdd   :  { %v108_v5 = vpop.f32.mrb[0].mxu1 }
  0xde   :  { %v109_v7 = vadd.f32 %v401_v4, %v108_v5  ;;  %v435_v8 = vpop.f32.mrb[1].mxu1 }
  0xdf   :  { %v111_v9 = vpop.f32.mrb[2].mxu1 }
  0xe0   :  { %v117_v11 = vadd.f32 %v115_v6, %v109_v7  ;;  %v112_v12 = vadd.f32 %v401_v4, %v111_v9  ;;  %v436_v13 = vpop.f32.mrb[3].mxu1 }
  0xe2   :  { %119 = vst.msk [vmem:[#allocation2] sm:$0xff] %vm70_vm0, %v117_v11  ;;  %v118_v14 = vadd.f32 %v116_v10, %v112_v12  ;;  %v123_v15 = vsel %vm70_vm0, %v117_v11, 0.0 }
  0xe3   :  { %124 = vadd.xlane.f32.xlu0 %v123_v15 }
  0xe4   :  { %120 = vst.msk [vmem:[#allocation2 + $0x8] sm:$0xff] %vm70_vm0, %v118_v14  ;;  %v126_v16 = vsel %vm70_vm0, %v118_v14, 0.0 }
  0xe7   :  { %127 = vadd.xlane.f32.xlu0 %v126_v16 }
 0x170   :  { %v125_v17 = vpop.xlane.xlu0 %124 }
 0x171   :  { %v130_v18 = vmul.f32 0.03125, %v125_v17 }
 0x173   :  { %v132_v19 = vsub.f32 %v117_v11, %v130_v18 }
 0x174   :  { %v128_v20 = vpop.xlane.xlu0 %127 }
 0x175   :  { %v131_v21 = vmul.f32 0.03125, %v128_v20  ;;  %v134_v22 = vmul.f32 %v132_v19, %v132_v19 }
 0x177   :  { %v133_v23 = vsub.f32 %v118_v14, %v131_v21  ;;  %v136_v24 = vsel %vm70_vm0, %v134_v22, 0.0 }
 0x178   :  { %137 = vadd.xlane.f32.xlu1 %v136_v24 }
 0x179   :  { %v135_v25 = vmul.f32 %v133_v23, %v133_v23 }
 0x17b   :  { %v139_v26 = vsel %vm70_vm0, %v135_v25, 0.0 }
 0x17c   :  { %140 = vadd.xlane.f32.xlu1 %v139_v26 }
 0x205   :  { %v138_v29 = vpop.xlane.xlu1 %137 }
 0x206   :  { %v142_v30 = vmul.f32 0.03125, %v138_v29 }
 0x208   :  { %v144_v31 = vadd.f32 1e-05, %v142_v30 }
 0x209   :  { %v141_v32 = vpop.xlane.xlu1 %140 }
 0x20a   :  { %469 = vrsqrt.f32 %v144_v31  ;;  %v143_v33 = vmul.f32 0.03125, %v141_v32  ;;  %v483_v32 = vmov -1.0  }
 0x20c   :  { %v145_v34 = vadd.f32 1e-05, %v143_v33 }
 0x20e   :  { %471 = vrsqrt.f32 %v145_v34 }
 0x214   :  { %v470_v35 = vpop.eup %469 }
 0x215   :  { %v148_v36 = vmul.f32 %v470_v35, %v132_v19 }
 0x217   :  { %v156_v39 = vmul.f32 %v406_v37, %v148_v36 }
 0x218   :  { %v472_v38 = vpop.eup %471 }
 0x219   :  { %v149_v40 = vmul.f32 %v472_v38, %v133_v23  ;;  %v164_v43 = vadd.f32 %v407_v41, %v156_v39 }
 0x21b   :  { %v157_v42 = vmul.f32 %v406_v37, %v149_v40 }
 0x21d   :  { %v165_v44 = vadd.f32 %v407_v41, %v157_v42 }
 0x21f   :  { %v166_v45 = vpack.c.bf16 %v165_v44, %v164_v43 }
 0x221   :  { %167 = vst.msk [vmem:[#allocation3] sm:$0xff] %vm70_vm0, %v166_v45 }
 0x228   :  { %v170_v46 = vld [vmem:[#allocation3] sm:$0xff] }
 0x229   :  { %442 = vmatmul.mubr.msk.bf16.vlgmr.msra.gmra.mrb[4].mxu1 %vm70_vm0, %v170_v46  ;;  %v294_v46 = vld [vmem:[#allocation4] sm:$0xff] }
 0x2fc   :  { %v232_v52 = vpop.f32.mrb[4].mxu1 }
 0x2fd   :  { %v233_v53 = vadd.f32 %v408_v51, %v232_v52  ;;  %v443_v54 = vpop.f32.mrb[5].mxu1 }
 0x2fe   :  { %v235_v55 = vpop.f32.mrb[6].mxu1 }
 0x2ff   :  { %v241_v56 = vmul.f32 0.70710677, %v233_v53  ;;  %v236_v57 = vadd.f32 %v408_v51, %v235_v55  ;;  %v444_v58 = vpop.f32.mrb[7].mxu1  ;;  %v239_v40 = vmul.f32 0.5, %v233_v53  ;;  %v380_v53 = vld [vmem:[#allocation2] sm:$0xff] }
 0x300   :  { %v381_v58 = vld [vmem:[#allocation2 + $0x8] sm:$0xff] }
 0x301   :  { %v247_v59 = vand.u32 2147483647, %v241_v56  ;;  %v242_v60 = vmul.f32 0.70710677, %v236_v57  ;;  %vm243_vm2 = vcmp.ge.f32.partialorder %v241_v56, 0.0  ;;  %v240_v41 = vmul.f32 0.5, %v236_v57 }
 0x302   :  { %v245_v33 = vsel %vm243_vm2, 1.0, %v483_v32  ;;  %v417_v56 = vld [vmem:[%s630_s9] ss:$0 sm:$0xff] }
 0x303   :  { %v249_v61 = vmul.f32 0.3275911, %v247_v59  ;;  %v248_v62 = vand.u32 2147483647, %v242_v60  ;;  %v275_v2 = vsub.f32 0.0, %v247_v59  ;;  %vm244_vm3 = vcmp.ge.f32.partialorder %v242_v60, 0.0 }
 0x304   :  { %v246_v37 = vsel %vm244_vm3, 1.0, %v483_v32 }
 0x305   :  { %v251_v63 = vadd.f32 1.0, %v249_v61  ;;  %v250_v0 = vmul.f32 0.3275911, %v248_v62  ;;  %v276_v3 = vsub.f32 0.0, %v248_v62  ;;  %v277_v5 = vmul.f32 %v275_v2, %v247_v59 }
 0x307   :  { %473 = vrcp.f32 %v251_v63  ;;  %v252_v1 = vadd.f32 1.0, %v250_v0  ;;  %v278_v9 = vmul.f32 %v276_v3, %v248_v62  ;;  %v279_v10 = vmul.f32 1.442695, %v277_v5 }
 0x309   :  { %475 = vrcp.f32 %v252_v1  ;;  %v281_v15 = vmul.f32 1.442695, %v278_v9 }
 0x30a   :  { %477 = vpow2.f32 %v279_v10 }
 0x30b   :  { %479 = vpow2.f32 %v281_v15 }
 0x311   :  { %v474_v4 = vpop.eup %473 }
 0x312   :  { %v257_v6 = vmul.f32 1.0614054, %v474_v4 }
 0x313   :  { %v476_v7 = vpop.eup %475 }
 0x314   :  { %v259_v8 = vadd.f32 -1.4531521, %v257_v6  ;;  %v258_v11 = vmul.f32 1.0614054, %v476_v7  ;;  %v478_v26 = vpop.eup %477 }
 0x315   :  { %v480_v30 = vpop.eup %479 }
 0x316   :  { %v261_v12 = vmul.f32 %v474_v4, %v259_v8  ;;  %v260_v13 = vadd.f32 -1.4531521, %v258_v11 }
 0x318   :  { %v263_v14 = vadd.f32 1.4214138, %v261_v12  ;;  %v262_v16 = vmul.f32 %v476_v7, %v260_v13 }
 0x31a   :  { %v265_v17 = vmul.f32 %v474_v4, %v263_v14  ;;  %v264_v18 = vadd.f32 1.4214138, %v262_v16 }
 0x31c   :  { %v267_v19 = vadd.f32 -0.28449672, %v265_v17  ;;  %v266_v20 = vmul.f32 %v476_v7, %v264_v18 }
 0x31e   :  { %v269_v21 = vmul.f32 %v474_v4, %v267_v19  ;;  %v268_v22 = vadd.f32 -0.28449672, %v266_v20 }
 0x320   :  { %v271_v23 = vadd.f32 0.2548296, %v269_v21  ;;  %v270_v24 = vmul.f32 %v476_v7, %v268_v22 }
 0x322   :  { %v273_v25 = vmul.f32 %v474_v4, %v271_v23  ;;  %v272_v27 = vadd.f32 0.2548296, %v270_v24 }
 0x324   :  { %v283_v28 = vmul.f32 %v478_v26, %v273_v25  ;;  %v274_v29 = vmul.f32 %v476_v7, %v272_v27 }
 0x326   :  { %v285_v31 = vsub.f32 1.0, %v283_v28  ;;  %v284_v34 = vmul.f32 %v480_v30, %v274_v29 }
 0x328   :  { %v287_v35 = vmul.f32 %v285_v31, %v245_v33  ;;  %v286_v36 = vsub.f32 1.0, %v284_v34 }
 0x32a   :  { %v289_v38 = vadd.f32 1.0, %v287_v35  ;;  %v288_v39 = vmul.f32 %v286_v36, %v246_v37 }
 0x32c   :  { %v290_v42 = vadd.f32 1.0, %v288_v39  ;;  %v291_v43 = vmul.f32 %v289_v38, %v239_v40 }
 0x32e   :  { %v292_v44 = vmul.f32 %v290_v42, %v240_v41 }
 0x330   :  { %v293_v45 = vpack.c.bf16 %v292_v44, %v291_v43 }
 0x332   :  { %454 = vmatmul.mubr.msk.bf16.vlgmr.msra.gmra.mrb[0].mxu0 %vm328_vm4, %v293_v45 }
 0x405   :  { %v366_v47 = vpop.f32.mrb[0].mxu0 }
 0x406   :  { %v373_v49 = vadd.f32 %v366_v47, %v294_v46  ;;  %v455_v50 = vpop.f32.mrb[1].mxu0 }
 0x407   :  { %v369_v51 = vpop.f32.mrb[2].mxu0 }
 0x408   :  { %375 = vst.msk [vmem:[#allocation4] sm:$0xff] %vm70_vm0, %v373_v49  ;;  %v374_v52 = vadd.f32 %v369_v51, %v295_v48  ;;  %v456_v54 = vpop.f32.mrb[3].mxu0 }
 0x40a   :  { %376 = vst.msk [vmem:[#allocation4 + $0x8] sm:$0xff] %vm70_vm0, %v374_v52 }
 0x40f   :  { %v382_v55 = vld [vmem:[#allocation4] sm:$0xff] }
 0x410   :  { %v384_v57 = vadd.f32 %v382_v55, %v380_v53 }
 0x411   :  { %v383_v59 = vld [vmem:[#allocation4 + $0x8] sm:$0xff] }
 0x412   :  { %v393_v60 = vadd.f32 %v417_v56, %v384_v57  ;;  %v385_v61 = vadd.f32 %v383_v59, %v381_v58 }
 0x414   :  { %395 = vst.msk [vmem:[%s631_s10] sm:$0xff] %vm70_vm0, %v393_v60  ;;  %v394_v62 = vadd.f32 %v417_v56, %v385_v61 }
 0x416   :  { %396 = vst.msk [vmem:[%s631_s10 + $0x8] sm:$0xff] %vm70_vm0, %v394_v62 }

// kernel: gpt_forward.13
= control target key start
LH: loop header
LB: loop body
LE: loop exit
PB: predicated region body
PF: predicated region fallthrough
CT: control target
= control target key end

     0   :  { %v118_v1 = vmov 0   ;;  %vm46_vm0 = vcmask 261120   ;;  %s155_s1 = inlined_call_operand.vmem [shape: bf16[32,256], index: 1, kind: input, shape index: {}]   ;;  %s156_s0 = inlined_call_operand.vmem [shape: f32[8,32], index: 0, kind: input, shape index: {}]   ;;  %s157_s2 = inlined_call_operand.vmem [shape: f32[8,256], index: 2, kind: output, shape index: {}]  }
   0x1   :  { %v112_v0 = vld [vmem:[%s155_s1 + $0x4] ss:$8 sps:$4 sm:$0xff]   ;;  %82 = vmatprep.mubr.bf16.mxu0 %v118_v1  ;;  %v114_v2 = vld [vmem:[%s155_s1] ss:$8 sps:$4 sm:$0xff]   ;;  %v115_v3 = vld [vmem:[%s155_s1 + $0x14] ss:$8 sps:$4 sm:$0xff]  }
   0x2   :  { %50 = vmatprep.subr.bf16.mxu0 %v112_v0  ;;  %v117_v4 = vld [vmem:[%s155_s1 + $0x10] ss:$8 sps:$4 sm:$0xff]   ;;  %v20_v5 = vld [vmem:[%s156_s0] sm:$0xff] }
   0x3   :  { %51 = vmatpush1.bf16.msra.mxu0 %v114_v2  ;;  %v21_v6 = vpack.c.bf16 %v20_v5, %v20_v5 }
   0x4   :  { %52 = vmatprep.subr.bf16.mxu0 %v115_v3 }
   0x7   :  { %53 = vmatpush1.bf16.msra.mxu0 %v117_v4 }
   0xa   :  { %110 = vmatmul.mubr.msk.bf16.vlgmr.msra.gmra.mrb[0].mxu0 %vm46_vm0, %v21_v6 }
  0xdd   :  { %v84_v7 = vpop.f32.mrb[0].mxu0 }
  0xde   :  { %100 = vst [vmem:[%s157_s2] sm:$0xff] %v84_v7  ;;  %v86_v8 = vpop.f32.mrb[1].mxu0 }
  0xdf   :  { %101 = vst [vmem:[%s157_s2 + $0x8] sm:$0xff] %v86_v8  ;;  %v88_v9 = vpop.f32.mrb[2].mxu0 }
  0xe0   :  { %v89_v10 = vpop.f32.mrb[3].mxu0 }

</bundles_post_ra>
